<compile_context>
chip_gen: v5e
topology: v5e:2x2
jax: 0.10.0
libtpu: 0.0.40
codegen_flags: <defaults>
</compile_context>

<pallas_src>
import functools
import math

import jax
import jax.numpy as jnp
from jax.experimental import pallas as pl
from jax.experimental.pallas import tpu as pltpu  # noqa: F401  (TPU-specific tuning hooks)

# ----------------------------- config ---------------------------------------
VOCAB       = 100
TYPE_VOCAB  = 2
MAX_LEN     = 8          # seq length == MaxPool1d kernel size
HIDDEN      = 32         # bert_dim
N_HEADS     = 2
HEAD_DIM    = HIDDEN // N_HEADS
INTER       = 64         # FFN intermediate size
N_LAYERS    = 2
N_CLASS     = 3
DROP_P      = 0.1
BATCH       = 2
LN_EPS      = 1e-12
LANES       = 128        # slab lane width


# ----------------------------- fused Pallas kernel ---------------------------
def _fused_forward_kernel(emb_ref, maskg_ref, u_ref, w_ref, v_ref, o_ref,
                          *, woff, voff, drop_p):
    """Whole forward pass in one kernel.

    emb:   (B*S, H) f32   summed word+pos+type embeddings
    maskg: (B*NH, S) f32  additive attention bias, head-major group order
    u:     (B, H) f32     uniforms for the head dropout
    w:     (WR, 128) bf16 packed matmul weights (lane-dense, zero padded)
    v:     (VR, 128) f32  packed biases / LayerNorm params
    out:   (B, 128) f32   sigmoid probs in cols [0, n_class); rest is 0.5 padding
    """
    M, H = emb_ref.shape
    S = MAX_LEN
    B = M // S
    DH = HEAD_DIM
    scale = 1.0 / math.sqrt(DH)
    f32, bf16 = jnp.float32, jnp.bfloat16

    def vec(name, width=LANES):          # (1, width) f32 row from the vector slab
        r = voff[name]
        return v_ref[r:r + 1, :width]

    def wmat(name, rows):                # (rows, 128) bf16 block from the weight slab
        r = woff[name]
        return w_ref[r:r + rows, :]

    def layer_norm(x, gname, bname):     # f32 LayerNorm over the real H columns
        g = vec(gname, H)
        b = vec(bname, H)
        mu = jnp.mean(x, axis=-1, keepdims=True)
        var = jnp.mean((x - mu) ** 2, axis=-1, keepdims=True)
        return (x - mu) * jax.lax.rsqrt(var + LN_EPS) * g + b

    # additive mask bias, broadcast over query positions: (B*NH, 1, S)
    mask_b = maskg_ref[...][:, None, :]

    # ---- embedding layernorm (hot path kept as a 2-D (B*S, H) slab) ----
    h = layer_norm(emb_ref[...].astype(f32), "emb_ln_g", "emb_ln_b")

    # ---- transformer layers (static Python loop, N_LAYERS=2) ----
    for l in range(N_LAYERS):
        # fused QKV projection, head-major columns, N padded to 128 lanes
        qkv = jnp.dot(h.astype(bf16), wmat(f"wqkv{l}", H),
                      preferred_element_type=f32) + vec(f"bqkv{l}")      # (M, 128)
        qkv3 = qkv.reshape(B, S, LANES)                                  # leading split only

        # group heads along the leading (sublane-major) axis: (B*NH, S, 3*DH)
        blk = jnp.concatenate(
            [qkv3[:, :, hd * 3 * DH:(hd + 1) * 3 * DH] for hd in range(N_HEADS)],
            axis=0)
        qg = blk[..., 0:DH].astype(bf16)
        kg = blk[..., DH:2 * DH].astype(bf16)
        vg = blk[..., 2 * DH:3 * DH].astype(bf16)

        # one batched einsum over B*NH groups for scores and context
        s = jnp.einsum("gqd,gkd->gqk", qg, kg,
                       preferred_element_type=f32) * scale + mask_b      # (G, S, S)
        s = s - jnp.max(s, axis=-1, keepdims=True)
        p = jnp.exp(s)
        p = p * pl.reciprocal(jnp.sum(p, axis=-1, keepdims=True), approx=True)
        ctx = jnp.einsum("gqk,gkd->gqd", p.astype(bf16), vg,
                         preferred_element_type=f32)                     # (G, S, DH)

        # un-group heads back to a (M, H) slab (lane concat, no transpose)
        ctx2 = jnp.concatenate(
            [ctx[hd * B:(hd + 1) * B] for hd in range(N_HEADS)], axis=-1
        ).reshape(M, H)

        # single output projection (K = H), then residual + LN1
        attn = (jnp.dot(ctx2.astype(bf16), wmat(f"wo{l}", H),
                        preferred_element_type=f32) + vec(f"bo{l}"))[:, :H]
        h = layer_norm(attn + h, f"ln1_g{l}", f"ln1_b{l}")

        # FFN: both matmuls go to 128 lanes (zero-padded weights), GELU in f32
        ff = jnp.dot(h.astype(bf16), wmat(f"w1{l}", H),
                     preferred_element_type=f32) + vec(f"b1{l}")         # (M, 128)
        ff = jax.nn.gelu(ff)   # tanh approx; exact-erf parity -> approximate=False
        ff2 = (jnp.dot(ff.astype(bf16), wmat(f"w2{l}", LANES),
                       preferred_element_type=f32) + vec(f"b2{l}"))[:, :H]
        h = layer_norm(ff2 + h, f"ln2_g{l}", f"ln2_b{l}")

    # ---- head: ReLU -> max over seq -> dropout -> fc -> sigmoid ----
    hr = jnp.maximum(h, 0.0).reshape(B, S, H)
    pooled = jnp.max(hr, axis=1)                          # MaxPool1d(max_len) -> (B, H)

    keep = u_ref[...] >= drop_p                           # F.dropout (training=True default)
    pooled = jnp.where(keep, pooled * (1.0 / (1.0 - drop_p)), 0.0)

    # lane-dense FC: weights padded 3 -> 128 cols; real logits live in cols [0, 3)
    logits = jnp.dot(pooled.astype(bf16), wmat("fc_w", H),
                     preferred_element_type=f32) + vec("fc_b")           # (B, 128)
    o_ref[...] = jax.nn.sigmoid(logits).astype(o_ref.dtype)


def _whole(a):
    """Full-array BlockSpec (no grid): the whole tensor is one VMEM block."""
    nd = a.ndim
    return pl.BlockSpec(a.shape, lambda nd=nd: (0,) * nd)


# ----------------------------- parameter packing -----------------------------
def _pack_slab(entries, dtype):
    """Pack a list of (name, 2-D array) into one lane-dense (rows, 128) slab.

    Each entry gets an 8-row-aligned slot; its data occupies [:r, :c] of the
    slot and the rest is zero (so full-width matmuls against the slab are exact).
    Returns (slab, {name: row_offset}).  Offsets are static Python ints.
    """
    offs, row = {}, 0
    for name, a in entries:
        offs[name] = row
        row += max(8, ((a.shape[0] + 7) // 8) * 8)
    slab = jnp.zeros((row, LANES), dtype)
    for name, a in entries:
        r, c = a.shape
        slab = slab.at[offs[name]:offs[name] + r, :c].set(a.astype(dtype))
    return slab, offs


def init_params(key):
    def nrm(k, shape):
        return jax.random.normal(k, shape, dtype=jnp.float32) * 0.02

    keys = iter(jax.random.split(key, 64))
    params = {
        "word_emb": nrm(next(keys), (VOCAB, HIDDEN)),
        "pos_emb":  nrm(next(keys), (MAX_LEN, HIDDEN)),
        "type_emb": nrm(next(keys), (TYPE_VOCAB, HIDDEN)),
    }

    w_entries, v_entries = [], []
    v_entries += [("emb_ln_g", jnp.ones((1, HIDDEN))),
                  ("emb_ln_b", jnp.zeros((1, HIDDEN)))]
    for l in range(N_LAYERS):
        # fused QKV weight, head-major column order [q_h0|k_h0|v_h0|q_h1|k_h1|v_h1]
        w_entries.append((f"wqkv{l}", nrm(next(keys), (HIDDEN, 3 * HIDDEN))))
        v_entries.append((f"bqkv{l}", jnp.zeros((1, 3 * HIDDEN))))
        w_entries.append((f"wo{l}", nrm(next(keys), (HIDDEN, HIDDEN))))
        v_entries.append((f"bo{l}", jnp.zeros((1, HIDDEN))))
        v_entries.append((f"ln1_g{l}", jnp.ones((1, HIDDEN))))
        v_entries.append((f"ln1_b{l}", jnp.zeros((1, HIDDEN))))
        w_entries.append((f"w1{l}", nrm(next(keys), (HIDDEN, INTER))))
        v_entries.append((f"b1{l}", jnp.zeros((1, INTER))))
        # second FFN weight K-padded 64 -> 128 rows so the (M,128) GELU slab feeds it directly
        w2 = jnp.zeros((LANES, HIDDEN), jnp.float32).at[:INTER, :].set(
            nrm(next(keys), (INTER, HIDDEN)))
        w_entries.append((f"w2{l}", w2))
        v_entries.append((f"b2{l}", jnp.zeros((1, HIDDEN))))
        v_entries.append((f"ln2_g{l}", jnp.ones((1, HIDDEN))))
        v_entries.append((f"ln2_b{l}", jnp.zeros((1, HIDDEN))))
    w_entries.append(("fc_w", nrm(next(keys), (HIDDEN, N_CLASS))))   # padded 3 -> 128 cols
    v_entries.append(("fc_b", jnp.zeros((1, N_CLASS))))

    w_slab, w_off = _pack_slab(w_entries, jnp.bfloat16)   # matmul operands in bf16
    v_slab, v_off = _pack_slab(v_entries, jnp.float32)    # biases / LN params in f32
    params.update(w_slab=w_slab, v_slab=v_slab, w_off=w_off, v_off=v_off)
    return params


# ----------------------------- model glue ------------------------------------
def p_model_forward(params, x, seg_id, dropout_key):
    """x, seg_id: (B, S) int32 token / segment ids.  Returns (B, n_class) probs."""
    B, S = x.shape

    # attention mask exactly as in the torch module: (x != 0)
    x_mask = (x != 0).astype(jnp.float32)
    mask_bias = (1.0 - x_mask) * -10000.0                 # (B, S) additive bias
    mask_g = jnp.tile(mask_bias, (N_HEADS, 1))            # (B*NH, S), head-major groups

    # embedding gather is XLA glue; everything downstream runs in the fused kernel
    # TODO(synk): fuse the gather via scalar-prefetched token ids + in-kernel one-hot matmul.
    pos = jnp.arange(S)
    emb = (params["word_emb"][x]
           + params["pos_emb"][pos][None, :, :]
           + params["type_emb"][seg_id])                  # (B, S, H)
    emb2d = emb.reshape(B * S, HIDDEN)

    # dropout uniforms precomputed (F.dropout training-mode semantics, fixed seed);
    # the keep/scale mask itself is applied inside the kernel.
    u = jax.random.uniform(dropout_key, (B, HIDDEN), dtype=jnp.float32)

    kernel = functools.partial(_fused_forward_kernel,
                               woff=params["w_off"], voff=params["v_off"],
                               drop_p=DROP_P)
    args = (emb2d, mask_g, u, params["w_slab"], params["v_slab"])

    out128 = pl.pallas_call(
        kernel,
        out_shape=jax.ShapeDtypeStruct((B, LANES), jnp.float32),
        in_specs=[_whole(a) for a in args],
        out_specs=pl.BlockSpec((B, LANES), lambda: (0, 0)),
        cost_estimate=pl.CostEstimate(flops=650_000, transcendentals=3_000,
                                      bytes_accessed=230_000),
    )(*args)

    return out128[:, :N_CLASS]                            # lane-dense store, slice outside


# ----------------------------- main ------------------------------------------
if __name__ == "__main__":
    key = jax.random.PRNGKey(0)
    pkey, xkey, skey, dkey = jax.random.split(key, 4)

    params = init_params(pkey)

    # token ids (some zeros to exercise the attention-mask path)
    x = jax.random.randint(xkey, (BATCH, MAX_LEN), 0, VOCAB, dtype=jnp.int32)
    x = x.at[:, -2:].set(0)                                # padding tokens
    seg_id = jax.random.randint(skey, (BATCH, MAX_LEN), 0, TYPE_VOCAB, dtype=jnp.int32)

    out = p_model_forward(params, x, seg_id, dkey)
    out = jax.block_until_ready(out)

    assert out.shape == (BATCH, N_CLASS)
    assert bool(jnp.all(jnp.isfinite(out)))
    assert bool(jnp.all((out >= 0.0) & (out <= 1.0)))
    print("KERNEL_OK")
</pallas_src>

<mosaic_0001>
module attributes {stable_mosaic.version = 11 : i64} {
  func.func @_fused_forward_kernel(%arg0: memref<16x32xf32, #tpu.memory_space<vmem>>, %arg1: memref<4x8xf32, #tpu.memory_space<vmem>>, %arg2: memref<2x32xf32, #tpu.memory_space<vmem>>, %arg3: memref<480x128xbf16, #tpu.memory_space<vmem>>, %arg4: memref<152x128xf32, #tpu.memory_space<vmem>>, %arg5: memref<2x128xf32, #tpu.memory_space<vmem>>) attributes {dimension_semantics = [], scalar_prefetch = 0 : i64, scratch_operands = 0 : i64, tpu.core_type = #tpu.core_type<tc>} {
    %c0 = arith.constant 0 : index
    %c0_0 = arith.constant 0 : index
    %0 = vector.load %arg1[%c0, %c0_0] : memref<4x8xf32, #tpu.memory_space<vmem>>, vector<4x8xf32>
    %1 = vector.shape_cast %0 : vector<4x8xf32> to vector<4x1x8xf32>
    %c0_1 = arith.constant 0 : index
    %c0_2 = arith.constant 0 : index
    %2 = vector.load %arg0[%c0_1, %c0_2] : memref<16x32xf32, #tpu.memory_space<vmem>>, vector<16x32xf32>
    %c0_3 = arith.constant 0 : index
    %c0_4 = arith.constant 0 : index
    %3 = vector.load %arg4[%c0_3, %c0_4] : memref<152x128xf32, #tpu.memory_space<vmem>>, vector<1x32xf32>
    %c8 = arith.constant 8 : index
    %c0_5 = arith.constant 0 : index
    %4 = vector.load %arg4[%c8, %c0_5] : memref<152x128xf32, #tpu.memory_space<vmem>>, vector<1x32xf32>
    %cst = arith.constant dense<0.000000e+00> : vector<16xf32>
    %5 = vector.multi_reduction <add>, %2, %cst [1] : vector<16x32xf32> to vector<16xf32>
    %6 = vector.shape_cast %5 : vector<16xf32> to vector<16x1xf32>
    %cst_6 = arith.constant 3.200000e+01 : f32
    %7 = vector.broadcast %cst_6 : f32 to vector<16x1xf32>
    %8 = arith.divf %6, %7 : vector<16x1xf32>
    %9 = vector.broadcast %8 : vector<16x1xf32> to vector<16x32xf32>
    %10 = arith.subf %2, %9 : vector<16x32xf32>
    %11 = arith.mulf %10, %10 : vector<16x32xf32>
    %cst_7 = arith.constant dense<0.000000e+00> : vector<16xf32>
    %12 = vector.multi_reduction <add>, %11, %cst_7 [1] : vector<16x32xf32> to vector<16xf32>
    %13 = vector.shape_cast %12 : vector<16xf32> to vector<16x1xf32>
    %cst_8 = arith.constant 3.200000e+01 : f32
    %14 = vector.broadcast %cst_8 : f32 to vector<16x1xf32>
    %15 = arith.divf %13, %14 : vector<16x1xf32>
    %16 = vector.broadcast %8 : vector<16x1xf32> to vector<16x32xf32>
    %17 = arith.subf %2, %16 : vector<16x32xf32>
    %cst_9 = arith.constant 9.99999996E-13 : f32
    %18 = vector.broadcast %cst_9 : f32 to vector<16x1xf32>
    %19 = arith.addf %15, %18 : vector<16x1xf32>
    %20 = math.rsqrt %19 : vector<16x1xf32>
    %21 = vector.broadcast %20 : vector<16x1xf32> to vector<16x32xf32>
    %22 = arith.mulf %17, %21 : vector<16x32xf32>
    %23 = vector.broadcast %3 : vector<1x32xf32> to vector<16x32xf32>
    %24 = arith.mulf %22, %23 : vector<16x32xf32>
    %25 = vector.broadcast %4 : vector<1x32xf32> to vector<16x32xf32>
    %26 = arith.addf %24, %25 : vector<16x32xf32>
    %27 = arith.truncf %26 : vector<16x32xf32> to vector<16x32xbf16>
    %c0_10 = arith.constant 0 : index
    %c0_11 = arith.constant 0 : index
    %28 = vector.load %arg3[%c0_10, %c0_11] : memref<480x128xbf16, #tpu.memory_space<vmem>>, vector<32x128xbf16>
    %cst_12 = arith.constant dense<0.000000e+00> : vector<16x128xf32>
    %29 = tpu.matmul %27, %28, %cst_12 {dimension_numbers = #tpu.dot_dimension_numbers<[1], [0], [0], [1], [0, 0, 1, 1], [], []>} : vector<16x32xbf16>, vector<32x128xbf16>, vector<16x128xf32> -> vector<16x128xf32>
    %c16 = arith.constant 16 : index
    %c0_13 = arith.constant 0 : index
    %30 = vector.load %arg4[%c16, %c0_13] : memref<152x128xf32, #tpu.memory_space<vmem>>, vector<1x128xf32>
    %31 = vector.broadcast %30 : vector<1x128xf32> to vector<16x128xf32>
    %32 = arith.addf %29, %31 : vector<16x128xf32>
    %33 = vector.shape_cast %32 : vector<16x128xf32> to vector<2x8x128xf32>
    %34 = vector.extract_strided_slice %33 {offsets = [0, 0, 0], sizes = [2, 8, 48], strides = [1, 1, 1]} : vector<2x8x128xf32> to vector<2x8x48xf32>
    %35 = vector.extract_strided_slice %33 {offsets = [0, 0, 48], sizes = [2, 8, 48], strides = [1, 1, 1]} : vector<2x8x128xf32> to vector<2x8x48xf32>
    %36 = tpu.concatenate %34, %35 in 0 : vector<2x8x48xf32>, vector<2x8x48xf32> -> vector<4x8x48xf32>
    %37 = vector.extract_strided_slice %36 {offsets = [0, 0, 0], sizes = [4, 8, 16], strides = [1, 1, 1]} : vector<4x8x48xf32> to vector<4x8x16xf32>
    %38 = arith.truncf %37 : vector<4x8x16xf32> to vector<4x8x16xbf16>
    %39 = vector.extract_strided_slice %36 {offsets = [0, 0, 16], sizes = [4, 8, 16], strides = [1, 1, 1]} : vector<4x8x48xf32> to vector<4x8x16xf32>
    %40 = arith.truncf %39 : vector<4x8x16xf32> to vector<4x8x16xbf16>
    %41 = vector.extract_strided_slice %36 {offsets = [0, 0, 32], sizes = [4, 8, 16], strides = [1, 1, 1]} : vector<4x8x48xf32> to vector<4x8x16xf32>
    %42 = arith.truncf %41 : vector<4x8x16xf32> to vector<4x8x16xbf16>
    "tpu.trace_start"() <{level = 10 : i32, message = "gqd,gkd->gqk"}> : () -> ()
    %cst_14 = arith.constant dense<0.000000e+00> : vector<4x8x8xf32>
    %43 = tpu.matmul %38, %40, %cst_14 {dimension_numbers = #tpu.dot_dimension_numbers<[2], [2], [1], [1], [0, 0, 0, 1, 1, 1], [0], [0]>} : vector<4x8x16xbf16>, vector<4x8x16xbf16>, vector<4x8x8xf32> -> vector<4x8x8xf32>
    "tpu.trace_stop"() : () -> ()
    %cst_15 = arith.constant 2.500000e-01 : f32
    %44 = vector.broadcast %cst_15 : f32 to vector<4x8x8xf32>
    %45 = arith.mulf %43, %44 : vector<4x8x8xf32>
    %46 = vector.broadcast %1 : vector<4x1x8xf32> to vector<4x8x8xf32>
    %47 = arith.addf %45, %46 : vector<4x8x8xf32>
    %cst_16 = arith.constant dense<0xFF800000> : vector<4x8xf32>
    %48 = vector.multi_reduction <maximumf>, %47, %cst_16 [2] : vector<4x8x8xf32> to vector<4x8xf32>
    %49 = vector.shape_cast %48 : vector<4x8xf32> to vector<4x8x1xf32>
    %50 = vector.broadcast %49 : vector<4x8x1xf32> to vector<4x8x8xf32>
    %51 = arith.subf %47, %50 : vector<4x8x8xf32>
    %52 = math.exp %51 : vector<4x8x8xf32>
    %cst_17 = arith.constant dense<0.000000e+00> : vector<4x8xf32>
    %53 = vector.multi_reduction <add>, %52, %cst_17 [2] : vector<4x8x8xf32> to vector<4x8xf32>
    %54 = vector.shape_cast %53 : vector<4x8xf32> to vector<4x8x1xf32>
    %55 = tpu.reciprocal %54 {approx = true} : vector<4x8x1xf32> -> vector<4x8x1xf32>
    %56 = vector.broadcast %55 : vector<4x8x1xf32> to vector<4x8x8xf32>
    %57 = arith.mulf %52, %56 : vector<4x8x8xf32>
    %58 = arith.truncf %57 : vector<4x8x8xf32> to vector<4x8x8xbf16>
    "tpu.trace_start"() <{level = 10 : i32, message = "gqk,gkd->gqd"}> : () -> ()
    %cst_18 = arith.constant dense<0.000000e+00> : vector<4x8x16xf32>
    %59 = tpu.matmul %58, %42, %cst_18 {dimension_numbers = #tpu.dot_dimension_numbers<[2], [1], [1], [2], [0, 0, 0, 1, 1, 2], [0], [0]>} : vector<4x8x8xbf16>, vector<4x8x16xbf16>, vector<4x8x16xf32> -> vector<4x8x16xf32>
    "tpu.trace_stop"() : () -> ()
    %60 = vector.extract_strided_slice %59 {offsets = [0, 0, 0], sizes = [2, 8, 16], strides = [1, 1, 1]} : vector<4x8x16xf32> to vector<2x8x16xf32>
    %61 = vector.extract_strided_slice %59 {offsets = [2, 0, 0], sizes = [2, 8, 16], strides = [1, 1, 1]} : vector<4x8x16xf32> to vector<2x8x16xf32>
    %62 = tpu.concatenate %60, %61 in 2 : vector<2x8x16xf32>, vector<2x8x16xf32> -> vector<2x8x32xf32>
    %63 = vector.shape_cast %62 : vector<2x8x32xf32> to vector<16x32xf32>
    %64 = arith.truncf %63 : vector<16x32xf32> to vector<16x32xbf16>
    %c32 = arith.constant 32 : index
    %c0_19 = arith.constant 0 : index
    %65 = vector.load %arg3[%c32, %c0_19] : memref<480x128xbf16, #tpu.memory_space<vmem>>, vector<32x128xbf16>
    %cst_20 = arith.constant dense<0.000000e+00> : vector<16x128xf32>
    %66 = tpu.matmul %64, %65, %cst_20 {dimension_numbers = #tpu.dot_dimension_numbers<[1], [0], [0], [1], [0, 0, 1, 1], [], []>} : vector<16x32xbf16>, vector<32x128xbf16>, vector<16x128xf32> -> vector<16x128xf32>
    %c24 = arith.constant 24 : index
    %c0_21 = arith.constant 0 : index
    %67 = vector.load %arg4[%c24, %c0_21] : memref<152x128xf32, #tpu.memory_space<vmem>>, vector<1x128xf32>
    %68 = vector.broadcast %67 : vector<1x128xf32> to vector<16x128xf32>
    %69 = arith.addf %66, %68 : vector<16x128xf32>
    %70 = vector.extract_strided_slice %69 {offsets = [0, 0], sizes = [16, 32], strides = [1, 1]} : vector<16x128xf32> to vector<16x32xf32>
    %71 = arith.addf %70, %26 : vector<16x32xf32>
    %c32_22 = arith.constant 32 : index
    %c0_23 = arith.constant 0 : index
    %72 = vector.load %arg4[%c32_22, %c0_23] : memref<152x128xf32, #tpu.memory_space<vmem>>, vector<1x32xf32>
    %c40 = arith.constant 40 : index
    %c0_24 = arith.constant 0 : index
    %73 = vector.load %arg4[%c40, %c0_24] : memref<152x128xf32, #tpu.memory_space<vmem>>, vector<1x32xf32>
    %cst_25 = arith.constant dense<0.000000e+00> : vector<16xf32>
    %74 = vector.multi_reduction <add>, %71, %cst_25 [1] : vector<16x32xf32> to vector<16xf32>
    %75 = vector.shape_cast %74 : vector<16xf32> to vector<16x1xf32>
    %cst_26 = arith.constant 3.200000e+01 : f32
    %76 = vector.broadcast %cst_26 : f32 to vector<16x1xf32>
    %77 = arith.divf %75, %76 : vector<16x1xf32>
    %78 = vector.broadcast %77 : vector<16x1xf32> to vector<16x32xf32>
    %79 = arith.subf %71, %78 : vector<16x32xf32>
    %80 = arith.mulf %79, %79 : vector<16x32xf32>
    %cst_27 = arith.constant dense<0.000000e+00> : vector<16xf32>
    %81 = vector.multi_reduction <add>, %80, %cst_27 [1] : vector<16x32xf32> to vector<16xf32>
    %82 = vector.shape_cast %81 : vector<16xf32> to vector<16x1xf32>
    %cst_28 = arith.constant 3.200000e+01 : f32
    %83 = vector.broadcast %cst_28 : f32 to vector<16x1xf32>
    %84 = arith.divf %82, %83 : vector<16x1xf32>
    %85 = vector.broadcast %77 : vector<16x1xf32> to vector<16x32xf32>
    %86 = arith.subf %71, %85 : vector<16x32xf32>
    %cst_29 = arith.constant 9.99999996E-13 : f32
    %87 = vector.broadcast %cst_29 : f32 to vector<16x1xf32>
    %88 = arith.addf %84, %87 : vector<16x1xf32>
    %89 = math.rsqrt %88 : vector<16x1xf32>
    %90 = vector.broadcast %89 : vector<16x1xf32> to vector<16x32xf32>
    %91 = arith.mulf %86, %90 : vector<16x32xf32>
    %92 = vector.broadcast %72 : vector<1x32xf32> to vector<16x32xf32>
    %93 = arith.mulf %91, %92 : vector<16x32xf32>
    %94 = vector.broadcast %73 : vector<1x32xf32> to vector<16x32xf32>
    %95 = arith.addf %93, %94 : vector<16x32xf32>
    %96 = arith.truncf %95 : vector<16x32xf32> to vector<16x32xbf16>
    %c64 = arith.constant 64 : index
    %c0_30 = arith.constant 0 : index
    %97 = vector.load %arg3[%c64, %c0_30] : memref<480x128xbf16, #tpu.memory_space<vmem>>, vector<32x128xbf16>
    %cst_31 = arith.constant dense<0.000000e+00> : vector<16x128xf32>
    %98 = tpu.matmul %96, %97, %cst_31 {dimension_numbers = #tpu.dot_dimension_numbers<[1], [0], [0], [1], [0, 0, 1, 1], [], []>} : vector<16x32xbf16>, vector<32x128xbf16>, vector<16x128xf32> -> vector<16x128xf32>
    %c48 = arith.constant 48 : index
    %c0_32 = arith.constant 0 : index
    %99 = vector.load %arg4[%c48, %c0_32] : memref<152x128xf32, #tpu.memory_space<vmem>>, vector<1x128xf32>
    %100 = vector.broadcast %99 : vector<1x128xf32> to vector<16x128xf32>
    %101 = arith.addf %98, %100 : vector<16x128xf32>
    %102 = arith.mulf %101, %101 : vector<16x128xf32>
    %103 = arith.mulf %101, %102 : vector<16x128xf32>
    %cst_33 = arith.constant 4.471500e-02 : f32
    %104 = vector.broadcast %cst_33 : f32 to vector<16x128xf32>
    %105 = arith.mulf %104, %103 : vector<16x128xf32>
    %106 = arith.addf %101, %105 : vector<16x128xf32>
    %cst_34 = arith.constant 0.797884583 : f32
    %107 = vector.broadcast %cst_34 : f32 to vector<16x128xf32>
    %108 = arith.mulf %107, %106 : vector<16x128xf32>
    %109 = math.tanh %108 : vector<16x128xf32>
    %cst_35 = arith.constant 1.000000e+00 : f32
    %110 = vector.broadcast %cst_35 : f32 to vector<16x128xf32>
    %111 = arith.addf %110, %109 : vector<16x128xf32>
    %cst_36 = arith.constant 5.000000e-01 : f32
    %112 = vector.broadcast %cst_36 : f32 to vector<16x128xf32>
    %113 = arith.mulf %112, %111 : vector<16x128xf32>
    %114 = arith.mulf %101, %113 : vector<16x128xf32>
    %115 = arith.truncf %114 : vector<16x128xf32> to vector<16x128xbf16>
    %c96 = arith.constant 96 : index
    %c0_37 = arith.constant 0 : index
    %116 = vector.load %arg3[%c96, %c0_37] : memref<480x128xbf16, #tpu.memory_space<vmem>>, vector<128x128xbf16>
    %cst_38 = arith.constant dense<0.000000e+00> : vector<16x128xf32>
    %117 = tpu.matmul %115, %116, %cst_38 {dimension_numbers = #tpu.dot_dimension_numbers<[1], [0], [0], [1], [0, 0, 1, 1], [], []>} : vector<16x128xbf16>, vector<128x128xbf16>, vector<16x128xf32> -> vector<16x128xf32>
    %c56 = arith.constant 56 : index
    %c0_39 = arith.constant 0 : index
    %118 = vector.load %arg4[%c56, %c0_39] : memref<152x128xf32, #tpu.memory_space<vmem>>, vector<1x128xf32>
    %119 = vector.broadcast %118 : vector<1x128xf32> to vector<16x128xf32>
    %120 = arith.addf %117, %119 : vector<16x128xf32>
    %121 = vector.extract_strided_slice %120 {offsets = [0, 0], sizes = [16, 32], strides = [1, 1]} : vector<16x128xf32> to vector<16x32xf32>
    %122 = arith.addf %121, %95 : vector<16x32xf32>
    %c64_40 = arith.constant 64 : index
    %c0_41 = arith.constant 0 : index
    %123 = vector.load %arg4[%c64_40, %c0_41] : memref<152x128xf32, #tpu.memory_space<vmem>>, vector<1x32xf32>
    %c72 = arith.constant 72 : index
    %c0_42 = arith.constant 0 : index
    %124 = vector.load %arg4[%c72, %c0_42] : memref<152x128xf32, #tpu.memory_space<vmem>>, vector<1x32xf32>
    %cst_43 = arith.constant dense<0.000000e+00> : vector<16xf32>
    %125 = vector.multi_reduction <add>, %122, %cst_43 [1] : vector<16x32xf32> to vector<16xf32>
    %126 = vector.shape_cast %125 : vector<16xf32> to vector<16x1xf32>
    %cst_44 = arith.constant 3.200000e+01 : f32
    %127 = vector.broadcast %cst_44 : f32 to vector<16x1xf32>
    %128 = arith.divf %126, %127 : vector<16x1xf32>
    %129 = vector.broadcast %128 : vector<16x1xf32> to vector<16x32xf32>
    %130 = arith.subf %122, %129 : vector<16x32xf32>
    %131 = arith.mulf %130, %130 : vector<16x32xf32>
    %cst_45 = arith.constant dense<0.000000e+00> : vector<16xf32>
    %132 = vector.multi_reduction <add>, %131, %cst_45 [1] : vector<16x32xf32> to vector<16xf32>
    %133 = vector.shape_cast %132 : vector<16xf32> to vector<16x1xf32>
    %cst_46 = arith.constant 3.200000e+01 : f32
    %134 = vector.broadcast %cst_46 : f32 to vector<16x1xf32>
    %135 = arith.divf %133, %134 : vector<16x1xf32>
    %136 = vector.broadcast %128 : vector<16x1xf32> to vector<16x32xf32>
    %137 = arith.subf %122, %136 : vector<16x32xf32>
    %cst_47 = arith.constant 9.99999996E-13 : f32
    %138 = vector.broadcast %cst_47 : f32 to vector<16x1xf32>
    %139 = arith.addf %135, %138 : vector<16x1xf32>
    %140 = math.rsqrt %139 : vector<16x1xf32>
    %141 = vector.broadcast %140 : vector<16x1xf32> to vector<16x32xf32>
    %142 = arith.mulf %137, %141 : vector<16x32xf32>
    %143 = vector.broadcast %123 : vector<1x32xf32> to vector<16x32xf32>
    %144 = arith.mulf %142, %143 : vector<16x32xf32>
    %145 = vector.broadcast %124 : vector<1x32xf32> to vector<16x32xf32>
    %146 = arith.addf %144, %145 : vector<16x32xf32>
    %147 = arith.truncf %146 : vector<16x32xf32> to vector<16x32xbf16>
    %c224 = arith.constant 224 : index
    %c0_48 = arith.constant 0 : index
    %148 = vector.load %arg3[%c224, %c0_48] : memref<480x128xbf16, #tpu.memory_space<vmem>>, vector<32x128xbf16>
    %cst_49 = arith.constant dense<0.000000e+00> : vector<16x128xf32>
    %149 = tpu.matmul %147, %148, %cst_49 {dimension_numbers = #tpu.dot_dimension_numbers<[1], [0], [0], [1], [0, 0, 1, 1], [], []>} : vector<16x32xbf16>, vector<32x128xbf16>, vector<16x128xf32> -> vector<16x128xf32>
    %c80 = arith.constant 80 : index
    %c0_50 = arith.constant 0 : index
    %150 = vector.load %arg4[%c80, %c0_50] : memref<152x128xf32, #tpu.memory_space<vmem>>, vector<1x128xf32>
    %151 = vector.broadcast %150 : vector<1x128xf32> to vector<16x128xf32>
    %152 = arith.addf %149, %151 : vector<16x128xf32>
    %153 = vector.shape_cast %152 : vector<16x128xf32> to vector<2x8x128xf32>
    %154 = vector.extract_strided_slice %153 {offsets = [0, 0, 0], sizes = [2, 8, 48], strides = [1, 1, 1]} : vector<2x8x128xf32> to vector<2x8x48xf32>
    %155 = vector.extract_strided_slice %153 {offsets = [0, 0, 48], sizes = [2, 8, 48], strides = [1, 1, 1]} : vector<2x8x128xf32> to vector<2x8x48xf32>
    %156 = tpu.concatenate %154, %155 in 0 : vector<2x8x48xf32>, vector<2x8x48xf32> -> vector<4x8x48xf32>
    %157 = vector.extract_strided_slice %156 {offsets = [0, 0, 0], sizes = [4, 8, 16], strides = [1, 1, 1]} : vector<4x8x48xf32> to vector<4x8x16xf32>
    %158 = arith.truncf %157 : vector<4x8x16xf32> to vector<4x8x16xbf16>
    %159 = vector.extract_strided_slice %156 {offsets = [0, 0, 16], sizes = [4, 8, 16], strides = [1, 1, 1]} : vector<4x8x48xf32> to vector<4x8x16xf32>
    %160 = arith.truncf %159 : vector<4x8x16xf32> to vector<4x8x16xbf16>
    %161 = vector.extract_strided_slice %156 {offsets = [0, 0, 32], sizes = [4, 8, 16], strides = [1, 1, 1]} : vector<4x8x48xf32> to vector<4x8x16xf32>
    %162 = arith.truncf %161 : vector<4x8x16xf32> to vector<4x8x16xbf16>
    "tpu.trace_start"() <{level = 10 : i32, message = "gqd,gkd->gqk"}> : () -> ()
    %cst_51 = arith.constant dense<0.000000e+00> : vector<4x8x8xf32>
    %163 = tpu.matmul %158, %160, %cst_51 {dimension_numbers = #tpu.dot_dimension_numbers<[2], [2], [1], [1], [0, 0, 0, 1, 1, 1], [0], [0]>} : vector<4x8x16xbf16>, vector<4x8x16xbf16>, vector<4x8x8xf32> -> vector<4x8x8xf32>
    "tpu.trace_stop"() : () -> ()
    %cst_52 = arith.constant 2.500000e-01 : f32
    %164 = vector.broadcast %cst_52 : f32 to vector<4x8x8xf32>
    %165 = arith.mulf %163, %164 : vector<4x8x8xf32>
    %166 = vector.broadcast %1 : vector<4x1x8xf32> to vector<4x8x8xf32>
    %167 = arith.addf %165, %166 : vector<4x8x8xf32>
    %cst_53 = arith.constant dense<0xFF800000> : vector<4x8xf32>
    %168 = vector.multi_reduction <maximumf>, %167, %cst_53 [2] : vector<4x8x8xf32> to vector<4x8xf32>
    %169 = vector.shape_cast %168 : vector<4x8xf32> to vector<4x8x1xf32>
    %170 = vector.broadcast %169 : vector<4x8x1xf32> to vector<4x8x8xf32>
    %171 = arith.subf %167, %170 : vector<4x8x8xf32>
    %172 = math.exp %171 : vector<4x8x8xf32>
    %cst_54 = arith.constant dense<0.000000e+00> : vector<4x8xf32>
    %173 = vector.multi_reduction <add>, %172, %cst_54 [2] : vector<4x8x8xf32> to vector<4x8xf32>
    %174 = vector.shape_cast %173 : vector<4x8xf32> to vector<4x8x1xf32>
    %175 = tpu.reciprocal %174 {approx = true} : vector<4x8x1xf32> -> vector<4x8x1xf32>
    %176 = vector.broadcast %175 : vector<4x8x1xf32> to vector<4x8x8xf32>
    %177 = arith.mulf %172, %176 : vector<4x8x8xf32>
    %178 = arith.truncf %177 : vector<4x8x8xf32> to vector<4x8x8xbf16>
    "tpu.trace_start"() <{level = 10 : i32, message = "gqk,gkd->gqd"}> : () -> ()
    %cst_55 = arith.constant dense<0.000000e+00> : vector<4x8x16xf32>
    %179 = tpu.matmul %178, %162, %cst_55 {dimension_numbers = #tpu.dot_dimension_numbers<[2], [1], [1], [2], [0, 0, 0, 1, 1, 2], [0], [0]>} : vector<4x8x8xbf16>, vector<4x8x16xbf16>, vector<4x8x16xf32> -> vector<4x8x16xf32>
    "tpu.trace_stop"() : () -> ()
    %180 = vector.extract_strided_slice %179 {offsets = [0, 0, 0], sizes = [2, 8, 16], strides = [1, 1, 1]} : vector<4x8x16xf32> to vector<2x8x16xf32>
    %181 = vector.extract_strided_slice %179 {offsets = [2, 0, 0], sizes = [2, 8, 16], strides = [1, 1, 1]} : vector<4x8x16xf32> to vector<2x8x16xf32>
    %182 = tpu.concatenate %180, %181 in 2 : vector<2x8x16xf32>, vector<2x8x16xf32> -> vector<2x8x32xf32>
    %183 = vector.shape_cast %182 : vector<2x8x32xf32> to vector<16x32xf32>
    %184 = arith.truncf %183 : vector<16x32xf32> to vector<16x32xbf16>
    %c256 = arith.constant 256 : index
    %c0_56 = arith.constant 0 : index
    %185 = vector.load %arg3[%c256, %c0_56] : memref<480x128xbf16, #tpu.memory_space<vmem>>, vector<32x128xbf16>
    %cst_57 = arith.constant dense<0.000000e+00> : vector<16x128xf32>
    %186 = tpu.matmul %184, %185, %cst_57 {dimension_numbers = #tpu.dot_dimension_numbers<[1], [0], [0], [1], [0, 0, 1, 1], [], []>} : vector<16x32xbf16>, vector<32x128xbf16>, vector<16x128xf32> -> vector<16x128xf32>
    %c88 = arith.constant 88 : index
    %c0_58 = arith.constant 0 : index
    %187 = vector.load %arg4[%c88, %c0_58] : memref<152x128xf32, #tpu.memory_space<vmem>>, vector<1x128xf32>
    %188 = vector.broadcast %187 : vector<1x128xf32> to vector<16x128xf32>
    %189 = arith.addf %186, %188 : vector<16x128xf32>
    %190 = vector.extract_strided_slice %189 {offsets = [0, 0], sizes = [16, 32], strides = [1, 1]} : vector<16x128xf32> to vector<16x32xf32>
    %191 = arith.addf %190, %146 : vector<16x32xf32>
    %c96_59 = arith.constant 96 : index
    %c0_60 = arith.constant 0 : index
    %192 = vector.load %arg4[%c96_59, %c0_60] : memref<152x128xf32, #tpu.memory_space<vmem>>, vector<1x32xf32>
    %c104 = arith.constant 104 : index
    %c0_61 = arith.constant 0 : index
    %193 = vector.load %arg4[%c104, %c0_61] : memref<152x128xf32, #tpu.memory_space<vmem>>, vector<1x32xf32>
    %cst_62 = arith.constant dense<0.000000e+00> : vector<16xf32>
    %194 = vector.multi_reduction <add>, %191, %cst_62 [1] : vector<16x32xf32> to vector<16xf32>
    %195 = vector.shape_cast %194 : vector<16xf32> to vector<16x1xf32>
    %cst_63 = arith.constant 3.200000e+01 : f32
    %196 = vector.broadcast %cst_63 : f32 to vector<16x1xf32>
    %197 = arith.divf %195, %196 : vector<16x1xf32>
    %198 = vector.broadcast %197 : vector<16x1xf32> to vector<16x32xf32>
    %199 = arith.subf %191, %198 : vector<16x32xf32>
    %200 = arith.mulf %199, %199 : vector<16x32xf32>
    %cst_64 = arith.constant dense<0.000000e+00> : vector<16xf32>
    %201 = vector.multi_reduction <add>, %200, %cst_64 [1] : vector<16x32xf32> to vector<16xf32>
    %202 = vector.shape_cast %201 : vector<16xf32> to vector<16x1xf32>
    %cst_65 = arith.constant 3.200000e+01 : f32
    %203 = vector.broadcast %cst_65 : f32 to vector<16x1xf32>
    %204 = arith.divf %202, %203 : vector<16x1xf32>
    %205 = vector.broadcast %197 : vector<16x1xf32> to vector<16x32xf32>
    %206 = arith.subf %191, %205 : vector<16x32xf32>
    %cst_66 = arith.constant 9.99999996E-13 : f32
    %207 = vector.broadcast %cst_66 : f32 to vector<16x1xf32>
    %208 = arith.addf %204, %207 : vector<16x1xf32>
    %209 = math.rsqrt %208 : vector<16x1xf32>
    %210 = vector.broadcast %209 : vector<16x1xf32> to vector<16x32xf32>
    %211 = arith.mulf %206, %210 : vector<16x32xf32>
    %212 = vector.broadcast %192 : vector<1x32xf32> to vector<16x32xf32>
    %213 = arith.mulf %211, %212 : vector<16x32xf32>
    %214 = vector.broadcast %193 : vector<1x32xf32> to vector<16x32xf32>
    %215 = arith.addf %213, %214 : vector<16x32xf32>
    %216 = arith.truncf %215 : vector<16x32xf32> to vector<16x32xbf16>
    %c288 = arith.constant 288 : index
    %c0_67 = arith.constant 0 : index
    %217 = vector.load %arg3[%c288, %c0_67] : memref<480x128xbf16, #tpu.memory_space<vmem>>, vector<32x128xbf16>
    %cst_68 = arith.constant dense<0.000000e+00> : vector<16x128xf32>
    %218 = tpu.matmul %216, %217, %cst_68 {dimension_numbers = #tpu.dot_dimension_numbers<[1], [0], [0], [1], [0, 0, 1, 1], [], []>} : vector<16x32xbf16>, vector<32x128xbf16>, vector<16x128xf32> -> vector<16x128xf32>
    %c112 = arith.constant 112 : index
    %c0_69 = arith.constant 0 : index
    %219 = vector.load %arg4[%c112, %c0_69] : memref<152x128xf32, #tpu.memory_space<vmem>>, vector<1x128xf32>
    %220 = vector.broadcast %219 : vector<1x128xf32> to vector<16x128xf32>
    %221 = arith.addf %218, %220 : vector<16x128xf32>
    %222 = arith.mulf %221, %221 : vector<16x128xf32>
    %223 = arith.mulf %221, %222 : vector<16x128xf32>
    %cst_70 = arith.constant 4.471500e-02 : f32
    %224 = vector.broadcast %cst_70 : f32 to vector<16x128xf32>
    %225 = arith.mulf %224, %223 : vector<16x128xf32>
    %226 = arith.addf %221, %225 : vector<16x128xf32>
    %cst_71 = arith.constant 0.797884583 : f32
    %227 = vector.broadcast %cst_71 : f32 to vector<16x128xf32>
    %228 = arith.mulf %227, %226 : vector<16x128xf32>
    %229 = math.tanh %228 : vector<16x128xf32>
    %cst_72 = arith.constant 1.000000e+00 : f32
    %230 = vector.broadcast %cst_72 : f32 to vector<16x128xf32>
    %231 = arith.addf %230, %229 : vector<16x128xf32>
    %cst_73 = arith.constant 5.000000e-01 : f32
    %232 = vector.broadcast %cst_73 : f32 to vector<16x128xf32>
    %233 = arith.mulf %232, %231 : vector<16x128xf32>
    %234 = arith.mulf %221, %233 : vector<16x128xf32>
    %235 = arith.truncf %234 : vector<16x128xf32> to vector<16x128xbf16>
    %c320 = arith.constant 320 : index
    %c0_74 = arith.constant 0 : index
    %236 = vector.load %arg3[%c320, %c0_74] : memref<480x128xbf16, #tpu.memory_space<vmem>>, vector<128x128xbf16>
    %cst_75 = arith.constant dense<0.000000e+00> : vector<16x128xf32>
    %237 = tpu.matmul %235, %236, %cst_75 {dimension_numbers = #tpu.dot_dimension_numbers<[1], [0], [0], [1], [0, 0, 1, 1], [], []>} : vector<16x128xbf16>, vector<128x128xbf16>, vector<16x128xf32> -> vector<16x128xf32>
    %c120 = arith.constant 120 : index
    %c0_76 = arith.constant 0 : index
    %238 = vector.load %arg4[%c120, %c0_76] : memref<152x128xf32, #tpu.memory_space<vmem>>, vector<1x128xf32>
    %239 = vector.broadcast %238 : vector<1x128xf32> to vector<16x128xf32>
    %240 = arith.addf %237, %239 : vector<16x128xf32>
    %241 = vector.extract_strided_slice %240 {offsets = [0, 0], sizes = [16, 32], strides = [1, 1]} : vector<16x128xf32> to vector<16x32xf32>
    %242 = arith.addf %241, %215 : vector<16x32xf32>
    %c128 = arith.constant 128 : index
    %c0_77 = arith.constant 0 : index
    %243 = vector.load %arg4[%c128, %c0_77] : memref<152x128xf32, #tpu.memory_space<vmem>>, vector<1x32xf32>
    %c136 = arith.constant 136 : index
    %c0_78 = arith.constant 0 : index
    %244 = vector.load %arg4[%c136, %c0_78] : memref<152x128xf32, #tpu.memory_space<vmem>>, vector<1x32xf32>
    %cst_79 = arith.constant dense<0.000000e+00> : vector<16xf32>
    %245 = vector.multi_reduction <add>, %242, %cst_79 [1] : vector<16x32xf32> to vector<16xf32>
    %246 = vector.shape_cast %245 : vector<16xf32> to vector<16x1xf32>
    %cst_80 = arith.constant 3.200000e+01 : f32
    %247 = vector.broadcast %cst_80 : f32 to vector<16x1xf32>
    %248 = arith.divf %246, %247 : vector<16x1xf32>
    %249 = vector.broadcast %248 : vector<16x1xf32> to vector<16x32xf32>
    %250 = arith.subf %242, %249 : vector<16x32xf32>
    %251 = arith.mulf %250, %250 : vector<16x32xf32>
    %cst_81 = arith.constant dense<0.000000e+00> : vector<16xf32>
    %252 = vector.multi_reduction <add>, %251, %cst_81 [1] : vector<16x32xf32> to vector<16xf32>
    %253 = vector.shape_cast %252 : vector<16xf32> to vector<16x1xf32>
    %cst_82 = arith.constant 3.200000e+01 : f32
    %254 = vector.broadcast %cst_82 : f32 to vector<16x1xf32>
    %255 = arith.divf %253, %254 : vector<16x1xf32>
    %256 = vector.broadcast %248 : vector<16x1xf32> to vector<16x32xf32>
    %257 = arith.subf %242, %256 : vector<16x32xf32>
    %cst_83 = arith.constant 9.99999996E-13 : f32
    %258 = vector.broadcast %cst_83 : f32 to vector<16x1xf32>
    %259 = arith.addf %255, %258 : vector<16x1xf32>
    %260 = math.rsqrt %259 : vector<16x1xf32>
    %261 = vector.broadcast %260 : vector<16x1xf32> to vector<16x32xf32>
    %262 = arith.mulf %257, %261 : vector<16x32xf32>
    %263 = vector.broadcast %243 : vector<1x32xf32> to vector<16x32xf32>
    %264 = arith.mulf %262, %263 : vector<16x32xf32>
    %265 = vector.broadcast %244 : vector<1x32xf32> to vector<16x32xf32>
    %266 = arith.addf %264, %265 : vector<16x32xf32>
    %cst_84 = arith.constant 0.000000e+00 : f32
    %267 = vector.broadcast %cst_84 : f32 to vector<16x32xf32>
    %268 = arith.maximumf %266, %267 : vector<16x32xf32>
    %269 = vector.shape_cast %268 : vector<16x32xf32> to vector<2x8x32xf32>
    %cst_85 = arith.constant dense<0xFF800000> : vector<2x32xf32>
    %270 = vector.multi_reduction <maximumf>, %269, %cst_85 [1] : vector<2x8x32xf32> to vector<2x32xf32>
    %c0_86 = arith.constant 0 : index
    %c0_87 = arith.constant 0 : index
    %271 = vector.load %arg2[%c0_86, %c0_87] : memref<2x32xf32, #tpu.memory_space<vmem>>, vector<2x32xf32>
    %cst_88 = arith.constant 1.000000e-01 : f32
    %272 = vector.broadcast %cst_88 : f32 to vector<2x32xf32>
    %273 = arith.cmpf oge, %271, %272 : vector<2x32xf32>
    %cst_89 = arith.constant 1.11111116 : f32
    %274 = vector.broadcast %cst_89 : f32 to vector<2x32xf32>
    %275 = arith.mulf %270, %274 : vector<2x32xf32>
    %cst_90 = arith.constant 0.000000e+00 : f32
    %276 = vector.broadcast %cst_90 : f32 to vector<2x32xf32>
    %277 = arith.select %273, %275, %276 : vector<2x32xi1>, vector<2x32xf32>
    %278 = arith.truncf %277 : vector<2x32xf32> to vector<2x32xbf16>
    %c448 = arith.constant 448 : index
    %c0_91 = arith.constant 0 : index
    %279 = vector.load %arg3[%c448, %c0_91] : memref<480x128xbf16, #tpu.memory_space<vmem>>, vector<32x128xbf16>
    %cst_92 = arith.constant dense<0.000000e+00> : vector<2x128xf32>
    %280 = tpu.matmul %278, %279, %cst_92 {dimension_numbers = #tpu.dot_dimension_numbers<[1], [0], [0], [1], [0, 0, 1, 1], [], []>} : vector<2x32xbf16>, vector<32x128xbf16>, vector<2x128xf32> -> vector<2x128xf32>
    %c144 = arith.constant 144 : index
    %c0_93 = arith.constant 0 : index
    %281 = vector.load %arg4[%c144, %c0_93] : memref<152x128xf32, #tpu.memory_space<vmem>>, vector<1x128xf32>
    %282 = vector.broadcast %281 : vector<1x128xf32> to vector<2x128xf32>
    %283 = arith.addf %280, %282 : vector<2x128xf32>
    %284 = arith.negf %283 : vector<2x128xf32>
    %285 = math.exp %284 : vector<2x128xf32>
    %cst_94 = arith.constant 1.000000e+00 : f32
    %286 = vector.broadcast %cst_94 : f32 to vector<2x128xf32>
    %287 = arith.addf %286, %285 : vector<2x128xf32>
    %288 = arith.divf %286, %287 : vector<2x128xf32>
    %c0_95 = arith.constant 0 : index
    %c0_96 = arith.constant 0 : index
    %289 = vector.load %arg5[%c0_95, %c0_96] : memref<2x128xf32, #tpu.memory_space<vmem>>, vector<2x128xf32>
    tpu.vector_store %arg5[%c0_95, %c0_96], %288 {strides = array<i32>} : memref<2x128xf32, #tpu.memory_space<vmem>>, vector<2x128xf32>,
    return
  }
}

</mosaic_0001>

<bundles_post_ra>
// kernel: tpu_custom_call.1
= control target key start
LH: loop header
LB: loop body
LE: loop exit
PB: predicated region body
PF: predicated region fallthrough
CT: control target
= control target key end

     0   :  { %10 = vsyncpa [#allocation3], 0  ;;  %s2110_s0 = inlined_call_operand.hbm [shape: f32[16,32], index: 0, kind: input, shape index: {}]   ;;  %s2111_s1 = inlined_call_operand.hbm [shape: f32[4,8], index: 1, kind: input, shape index: {}]   ;;  %s2112_s2 = inlined_call_operand.hbm [shape: f32[2,32], index: 2, kind: input, shape index: {}]   ;;  %s2113_s3 = inlined_call_operand.hbm [shape: bf16[480,128], index: 3, kind: input, shape index: {}]   ;;  %s2114_s4 = inlined_call_operand.hbm [shape: f32[152,128], index: 4, kind: input, shape index: {}]   ;;  %s2115_s5 = inlined_call_operand.hbm [shape: f32[2,128], index: 5, kind: output, shape index: {}]  }
   0x1   :  { %11 = vsyncpa [#allocation6], 0 }
   0x2   :  { %12 = vsyncpa [#allocation9], 0  ;;  %s32_s20 = sshll.u32 %s2111_s1, 4  ;;  %s33_s20 = int_to_ptr.hbm [resolvable:$true] %s32_s20 }
   0x3   :  { %13 = vsyncpa [#allocation4], 0  ;;  %s1861_s21 = smov [#allocation5]   ;;  %s53_s25 = sshll.u32 %s2113_s3, 4  ;;  %s54_s25 = int_to_ptr.hbm [resolvable:$true] %s53_s25 }
   0x4   :  { %s34_s22 = sshll.u32 %s1861_s21, 4  ;;  %s1862_s26 = smov [#allocation8]   ;;  %s35_s22 = int_to_ptr.vmem [resolvable:$true] %s34_s22 }
   0x5   :  { %37 = dma.hbm_to_vmem [thread:$0]  %s33_s20, 64, %s35_s22, [#allocation6]  }
   0x6   :  { %s55_s27 = sshll.u32 %s1862_s26, 4  ;;  %s1863_s28 = smov 64   ;;  %s56_s27 = int_to_ptr.vmem [resolvable:$true] %s55_s27 }
   0x7   :  { %s1864_s29 = smov 4   ;;  %s18_s1 = sshll.u32 %s2110_s0, 4  ;;  %s19_s1 = int_to_ptr.hbm [resolvable:$true] %s18_s1 }
   0x8   :  { %61 = dma.hbm_to_vmem [thread:$0]  %s54_s25, 3840, %s56_s27, [#allocation9], %s1863_s28, %s1863_s28, %s1864_s29  }
   0x9   :  { %s1865_s7 = smov [#allocation2]   ;;  %s43_s3 = sshll.u32 %s2112_s2, 4  ;;  %s44_s3 = int_to_ptr.hbm [resolvable:$true] %s43_s3 }
   0xa   :  { %s20_s8 = sshll.u32 %s1865_s7, 4  ;;  %s1866_s11 = smov 128   ;;  %s21_s8 = int_to_ptr.vmem [resolvable:$true] %s20_s8 }
   0xb   :  { %s1867_s12 = smov 8   ;;  %s1868_s13 = smov [#allocation7]  }
   0xc   :  { %26 = dma.hbm_to_vmem [thread:$0]  %s19_s1, 256, %s21_s8, [#allocation3], %s1866_s11, %s1866_s11, %s1867_s12  }
   0xd   :  { %s45_s14 = sshll.u32 %s1868_s13, 4  ;;  %s66_s17 = sshll.u32 %s2114_s4, 4  ;;  %s46_s14 = int_to_ptr.vmem [resolvable:$true] %s45_s14  ;;  %s67_s17 = int_to_ptr.hbm [resolvable:$true] %s66_s17 }
   0xe   :  { %48 = dma.hbm_to_vmem [thread:$0]  %s44_s3, 32, %s46_s14, [#allocation6]  }
   0xf   :  { %s1869_s0 = smov [#allocation10]  }
  0x10   :  { %s68_s18 = sshll.u32 %s1869_s0, 4  ;;  %s69_s18 = int_to_ptr.vmem [resolvable:$true] %s68_s18 }
  0x11   :  { %74 = dma.hbm_to_vmem [thread:$0]  %s67_s17, 2432, %s69_s18, [#allocation9], %s1866_s11, %s1866_s11, %s1867_s12  }
  0x12   :  { %1853 = dma.done.wait [#allocation3], 256  }
  0x13   :  { %1854 = vsyncadd [#allocation3], 4294967040 }
  0x14   :  { %1855 = dma.done.wait [#allocation6], 96  }
  0x15   :  { %1856 = vsyncadd [#allocation6], 4294967200 }
  0x16   :  { %1857 = dma.done.wait [#allocation9], 6272  }
  0x17   :  { %1858 = vsyncadd [#allocation9], 4294961024  ;;  %vm105_vm0 = vcmask 261120   ;;  %v101_v0 = vld [vmem:[#allocation2] sm:$0xff]  ;;  %v102_v1 = vld [vmem:[#allocation2 + $0x8] sm:$0xff]  ;;  %v1870_v4 = vmov 32.0  }
  0x18   :  { %v106_v2 = vsel %vm105_vm0, %v101_v0, 0.0  ;;  %v109_v3 = vsel %vm105_vm0, %v102_v1, 0.0  ;;  %1643 = vrcp.f32 %v1870_v4  ;;  %v1565_v21 = vld [vmem:[#allocation8 + $0x8] sm:$0xff]  ;;  %v1564_v23 = vld [vmem:[#allocation8] sm:$0xff]  ;;  %v1624_v42 = vld [vmem:[#allocation10] ss:$0 sm:$0xff] }
  0x19   :  { %107 = vadd.xlane.f32.xlu0 %v106_v2  ;;  %191 = vmatpush.bf16.msra.mxu2 %v1565_v21  ;;  %v1625_v47 = vld [vmem:[#allocation10 + $0x8] ss:$0 sm:$0xff]  ;;  %v1626_v52 = vld [vmem:[#allocation10 + $0x10] ss:$0 sm:$0xff]  ;;  %s1871_s2 = smov 80   ;;  %s1872_s4 = smov 112  }
  0x1a   :  { %vm216_vm8 = vcmask 130048   ;;  %vm324_vm9 = vcmask 64512   ;;  %s1873_s19 = smov 96   ;;  %vm378_vm10 = vcmask 1043456   ;;  %s1874_s20 = smov 16  }
  0x1b   :  { %s1875_s21 = smov [#allocation11]   ;;  %s1408_s25 = sshll.u32 %s2115_s5, 4  ;;  %s1409_s25 = int_to_ptr.hbm [resolvable:$true] %s1408_s25 }
  0x1c   :  { %s1406_s22 = sshll.u32 %s1875_s21, 4  ;;  %s1407_s22 = int_to_ptr.vmem [resolvable:$true] %s1406_s22 }
  0x1d   :  { %192 = vmatpush.bf16.msra.mxu2 %v1564_v23 }
  0x1e   :  { %v1644_v5 = vpop.eup %1643 }
  0x1f   :  { %v113_v6 = vmul.f32 32.0, %v1644_v5  ;;  %vm117_vm1 = vweird.f32 %v1644_v5 }
  0x21   :  { %110 = vadd.xlane.f32.xlu0 %v109_v3  ;;  %v114_v7 = vsub.f32 1.0, %v113_v6 }
  0x23   :  { %v115_v8 = vmul.f32 %v1644_v5, %v114_v7 }
  0x25   :  { %v116_v9 = vadd.f32 %v1644_v5, %v115_v8 }
  0x27   :  { %v1923_v10 = vsel %vm117_vm1, %v1644_v5, %v116_v9 }
  0x8c   :  { %v108_v11 = vpop.xlane.xlu0 %107 }
  0x8d   :  { %v119_v12 = vmul.f32 %v1923_v10, %v108_v11 }
  0x8f   :  { %v121_v13 = vsub.f32 %v101_v0, %v119_v12 }
  0x91   :  { %v123_v14 = vmul.f32 %v121_v13, %v121_v13 }
  0x93   :  { %v125_v15 = vsel %vm105_vm0, %v123_v14, 0.0 }
  0x94   :  { %126 = vadd.xlane.f32.xlu1 %v125_v15  ;;  %v111_v16 = vpop.xlane.xlu0 %110 }
  0x95   :  { %v120_v17 = vmul.f32 %v1923_v10, %v111_v16  ;;  %v1961_v16 = vld [vmem:[#allocation5] sm:$0xf] }
  0x97   :  { %v122_v18 = vsub.f32 %v102_v1, %v120_v17  ;;  %v98_v17 = vrot.slane %v1961_v16, 1 }
  0x99   :  { %v124_v19 = vmul.f32 %v122_v18, %v122_v18 }
  0x9b   :  { %v128_v20 = vsel %vm105_vm0, %v124_v19, 0.0 }
  0x9c   :  { %129 = vadd.xlane.f32.xlu1 %v128_v20 }
 0x107   :  { %v127_v22 = vpop.xlane.xlu1 %126 }
 0x108   :  { %v131_v24 = vmul.f32 %v127_v22, %v1923_v10 }
 0x10a   :  { %v133_v25 = vadd.f32 1e-12, %v131_v24 }
 0x10c   :  { %1645 = vrsqrt.f32 %v133_v25  ;;  %vm141_vm3 = vweird.f32 %v133_v25 }
 0x10f   :  { %v130_v26 = vpop.xlane.xlu1 %129 }
 0x110   :  { %v132_v27 = vmul.f32 %v130_v26, %v1923_v10  ;;  %v99_v26 = vrot.slane %v1961_v16, 2 }
 0x112   :  { %v1646_v28 = vpop.eup %1645  ;;  %v134_v29 = vadd.f32 1e-12, %v132_v27  ;;  %v100_v27 = vrot.slane %v1961_v16, 3 }
 0x113   :  { %v136_v30 = vmul.f32 %v1646_v28, %v133_v25  ;;  %vm142_vm2 = vweird.f32 %v1646_v28 }
 0x114   :  { %1647 = vrsqrt.f32 %v134_v29  ;;  %vm143_vm4 = vmor %vm141_vm3, %vm142_vm2  ;;  %vm151_vm6 = vweird.f32 %v134_v29 }
 0x115   :  { %v137_v31 = vmul.f32 %v1646_v28, %v136_v30 }
 0x117   :  { %v138_v32 = vmul.f32 0.5, %v137_v31  ;;  %v1973_v31 = vperm.slane %v100_v27, 0 }
 0x119   :  { %v139_v33 = vsub.f32 1.5, %v138_v32 }
 0x11a   :  { %v1648_v34 = vpop.eup %1647 }
 0x11b   :  { %v140_v35 = vmul.f32 %v1646_v28, %v139_v33  ;;  %v146_v36 = vmul.f32 %v1648_v34, %v134_v29  ;;  %vm152_vm5 = vweird.f32 %v1648_v34 }
 0x11c   :  { %vm153_vm7 = vmor %vm151_vm6, %vm152_vm5 }
 0x11d   :  { %v147_v37 = vmul.f32 %v1648_v34, %v146_v36  ;;  %v144_v38 = vsel %vm143_vm4, %v1646_v28, %v140_v35  ;;  %v1971_v28 = vperm.slane %v99_v26, 0 }
 0x11e   :  { %v155_v41 = vmul.f32 %v144_v38, %v121_v13  ;;  %v312_v38 = vperm.slane %v1961_v16, 0 }
 0x11f   :  { %v148_v39 = vmul.f32 0.5, %v147_v37 }
 0x120   :  { %v158_v46 = vmul.f32 %v1624_v42, %v155_v41 }
 0x121   :  { %v149_v40 = vsub.f32 1.5, %v148_v39 }
 0x122   :  { %v1931_v49 = vadd.f32 %v1625_v47, %v158_v46 }
 0x123   :  { %v150_v43 = vmul.f32 %v1648_v34, %v149_v40 }
 0x125   :  { %v154_v44 = vsel %vm153_vm7, %v1648_v34, %v150_v43 }
 0x126   :  { %v156_v45 = vmul.f32 %v154_v44, %v122_v18  ;;  %v1964_v18 = vperm.slane %v98_v17, 0 }
 0x128   :  { %v159_v48 = vmul.f32 %v1624_v42, %v156_v45 }
 0x12a   :  { %v1933_v50 = vadd.f32 %v1625_v47, %v159_v48 }
 0x12c   :  { %v163_v51 = vpack.c.bf16 %v1933_v50, %v1931_v49 }
 0x12e   :  { %1428 = vmatmul.msk.bf16.vlgmr.msra.gmra.mxu2 %vm105_vm0, %v163_v51 }
 0x1b1   :  { %v194_v53 = vpop.f32.mrf.mxu2 }
 0x1b2   :  { %v195_v54 = vadd.f32 %v1626_v52, %v194_v53 }
 0x1b4   :  { %201 = vrot.lane.b32.xlu2 %v195_v54, %s1871_s2  ;;  %v207_v59 = vpack.c.bf16 %v195_v54, %v195_v54 }
 0x1b6   :  { %v212_v61 = vunpack.c.l.b16 %v207_v59 }
 0x1b8   :  { %v1944_v62 = vpack.c.b16 %v212_v61, %v212_v61 }
 0x1b9   :  { %v196_v55 = vpop.f32.mrf.mxu2 }
 0x1ba   :  { %v197_v56 = vadd.f32 %v1626_v52, %v196_v55 }
 0x1bc   :  { %v208_v57 = vpack.c.bf16 %v197_v56, %v197_v56  ;;  %203 = vrot.lane.b32.xlu2 %v197_v56, %s1871_s2 }
 0x1be   :  { %v237_v58 = vunpack.c.l.b16 %v208_v57 }
 0x1c0   :  { %v1940_v60 = vpack.c.b16 %v237_v58, %v237_v58 }
 0x1c4   :  { %239 = vrot.lane.b32.xlu2 %v1940_v60, %s1872_s4 }
 0x1cc   :  { %214 = vrot.lane.b32.xlu2 %v1944_v62, %s1872_s4 }
 0x20e   :  { %v202_v63 = vpop.permute.xlu2 %201 }
 0x20f   :  { %v209_v0 = vpack.c.bf16 %v202_v63, %v202_v63 }
 0x211   :  { %v261_v1 = vunpack.c.l.b16 %v209_v0 }
 0x213   :  { %v262_v2 = vpack.c.b16 %v261_v1, %v261_v1 }
 0x215   :  { %263 = vrot.lane.b32.xlu0 %v262_v2, %s1872_s4 }
 0x216   :  { %v204_v3 = vpop.permute.xlu2 %203 }
 0x217   :  { %v210_v4 = vpack.c.bf16 %v204_v3, %v204_v3 }
 0x219   :  { %v285_v5 = vunpack.c.l.b16 %v210_v4 }
 0x21b   :  { %v1949_v6 = vpack.c.b16 %v285_v5, %v285_v5 }
 0x21d   :  { %287 = vrot.lane.b32.xlu1 %v1949_v6, %s1872_s4 }
 0x21e   :  { %v240_v7 = vpop.permute.xlu2 %239 }
 0x21f   :  { %v245_v8 = vsel %vm216_vm8, %v240_v7, 0 }
 0x220   :  { %254 = vmatpush.bf16.xpose.msrb.mxu2 %v245_v8 }
 0x226   :  { %v215_v9 = vpop.permute.xlu2 %214 }
 0x227   :  { %1430 = vmatmul.msk.bf16.vlgmr.msrb.gmra.mxu2 %vm216_vm8, %v208_v57  ;;  %v221_v11 = vsel %vm216_vm8, %v215_v9, 0 }
 0x228   :  { %230 = vmatpush.bf16.xpose.msra.mxu1 %v221_v11 }
 0x22f   :  { %1429 = vmatmul.msk.bf16.vlgmr.msra.gmra.mxu1 %vm216_vm8, %v207_v59 }
 0x287   :  { %v264_v12 = vpop.permute.xlu0 %263 }
 0x288   :  { %v269_v13 = vsel %vm216_vm8, %v264_v12, 0 }
 0x289   :  { %278 = vmatpush.bf16.xpose.msra.mxu3 %v269_v13 }
 0x28f   :  { %v288_v14 = vpop.permute.xlu1 %287 }
 0x290   :  { %1431 = vmatmul.msk.bf16.vlgmr.msra.gmra.mxu3 %vm216_vm8, %v209_v0  ;;  %v293_v15 = vsel %vm216_vm8, %v288_v14, 0 }
 0x291   :  { %302 = vmatpush.bf16.xpose.msra.mxu0 %v293_v15 }
 0x298   :  { %1432 = vmatmul.msk.bf16.vlgmr.msra.gmra.mxu0 %vm216_vm8, %v210_v4 }
 0x2aa   :  { %v256_v19 = vpop.f32.mrf.mxu2 }
 0x2ab   :  { %v309_v20 = vmul.f32 0.25, %v256_v19 }
 0x2ac   :  { %v232_v21 = vpop.f32.mrf.mxu1 }
 0x2ad   :  { %v321_v22 = vadd.f32 %v1964_v18, %v309_v20  ;;  %v308_v35 = vmul.f32 0.25, %v232_v21 }
 0x2af   :  { %v328_v23 = vsel %vm324_vm9, %v321_v22, -inf  ;;  %v320_v41 = vadd.f32 %v312_v38, %v308_v35 }
 0x2b0   :  { %329 = vmax.xlane.f32.xlu1 %v328_v23 }
 0x2b1   :  { %v325_v43 = vsel %vm324_vm9, %v320_v41, -inf }
 0x2b2   :  { %v258_v24 = vpop.f32.mrf.mxu2 }
 0x2b4   :  { %v234_v25 = vpop.f32.mrf.mxu1 }
 0x2c9   :  { %416 = vrot.lane.b32.xlu1 %v262_v2, %s1873_s19 }
 0x313   :  { %v280_v29 = vpop.f32.mrf.mxu3 }
 0x314   :  { %v310_v30 = vmul.f32 0.25, %v280_v29 }
 0x315   :  { %v304_v32 = vpop.f32.mrf.mxu0 }
 0x316   :  { %v311_v33 = vmul.f32 0.25, %v304_v32  ;;  %v322_v34 = vadd.f32 %v1971_v28, %v310_v30  ;;  %v1567_v30 = vld [vmem:[#allocation8 + $0x18] sm:$0xff] }
 0x318   :  { %v331_v36 = vsel %vm324_vm9, %v322_v34, -inf  ;;  %v323_v37 = vadd.f32 %v1973_v31, %v311_v33 }
 0x319   :  { %332 = vmax.xlane.f32.xlu2 %v331_v36 }
 0x31a   :  { %v334_v39 = vsel %vm324_vm9, %v323_v37, -inf }
 0x31b   :  { %v282_v40 = vpop.f32.mrf.mxu3  ;;  %335 = vmax.xlane.f32.xlu0 %v334_v39 }
 0x31d   :  { %v306_v42 = vpop.f32.mrf.mxu0 }
 0x31e   :  { %v1566_v42 = vld [vmem:[#allocation8 + $0x10] sm:$0xff] }
 0x321   :  { %326 = vmax.xlane.f32.xlu2 %v325_v43 }
 0x323   :  { %v330_v44 = vpop.xlane.xlu1 %329 }
 0x324   :  { %v338_v45 = vsub.f32 %v321_v22, %v330_v44 }
 0x326   :  { %v343_v46 = vmul.f32 1.442695, %v338_v45 }
 0x328   :  { %1649 = vpow2.f32 %v343_v46 }
 0x32e   :  { %v1650_v47 = vpop.eup %1649 }
 0x32f   :  { %v352_v48 = vsel %vm324_vm9, %v1650_v47, 0.0 }
 0x330   :  { %353 = vadd.xlane.f32.xlu2 %v352_v48 }
 0x33b   :  { %v417_v51 = vpop.permute.xlu1 %416 }
 0x33c   :  { %v422_v52 = vsel %vm378_vm10, %v417_v51, 0  ;;  %v1627_v51 = vld [vmem:[#allocation10 + $0x18] ss:$0 sm:$0xff] }
 0x33d   :  { %431 = vmatpush.bf16.msrb.mxu3 %v422_v52 }
 0x38c   :  { %v333_v53 = vpop.xlane.xlu2 %332 }
 0x38d   :  { %v339_v54 = vsub.f32 %v322_v34, %v333_v53 }
 0x38e   :  { %v336_v56 = vpop.xlane.xlu0 %335 }
 0x38f   :  { %v345_v55 = vmul.f32 1.442695, %v339_v54  ;;  %v340_v61 = vsub.f32 %v323_v37, %v336_v56 }
 0x391   :  { %1651 = vpow2.f32 %v345_v55  ;;  %v347_v1 = vmul.f32 1.442695, %v340_v61 }
 0x394   :  { %v327_v57 = vpop.xlane.xlu2 %326 }
 0x395   :  { %v337_v58 = vsub.f32 %v320_v41, %v327_v57 }
 0x397   :  { %v1652_v59 = vpop.eup %1651  ;;  %v341_v63 = vmul.f32 1.442695, %v337_v58 }
 0x398   :  { %v355_v0 = vsel %vm324_vm9, %v1652_v59, 0.0 }
 0x399   :  { %1653 = vpow2.f32 %v341_v63  ;;  %356 = vadd.xlane.f32.xlu0 %v355_v0 }
 0x39a   :  { %1655 = vpow2.f32 %v347_v1 }
 0x39f   :  { %v1654_v2 = vpop.eup %1653 }
 0x3a0   :  { %v349_v3 = vsel %vm324_vm9, %v1654_v2, 0.0  ;;  %v1656_v4 = vpop.eup %1655 }
 0x3a1   :  { %350 = vadd.xlane.f32.xlu2 %v349_v3  ;;  %v358_v5 = vsel %vm324_vm9, %v1656_v4, 0.0 }
 0x3a3   :  { %v354_v7 = vpop.xlane.xlu2 %353 }
 0x3a9   :  { %359 = vadd.xlane.f32.xlu2 %v358_v5 }
 0x3ad   :  { %437 = vrot.lane.b32.xlu0 %v1949_v6, %s1873_s19 }
 0x3b5   :  { %373 = vrot.lane.b32.xlu0 %v1944_v62, %s1873_s19 }
 0x3c1   :  { %395 = vrot.lane.b32.xlu2 %v1940_v60, %s1873_s19 }
 0x40c   :  { %v357_v8 = vpop.xlane.xlu0 %356 }
 0x40d   :  { %1657 = vrcp.f32 %v357_v8 }
 0x40e   :  { %1659 = vrcp.f32 %v354_v7 }
 0x413   :  { %v1658_v9 = vpop.eup %1657 }
 0x414   :  { %v367_v11 = vmul.f32 %v1658_v9, %v1652_v59  ;;  %v351_v12 = vpop.xlane.xlu2 %350  ;;  %v1660_v15 = vpop.eup %1659 }
 0x415   :  { %1661 = vrcp.f32 %v351_v12  ;;  %v366_v19 = vmul.f32 %v1660_v15, %v1650_v47 }
 0x416   :  { %v371_v13 = vpack.c.bf16 %v367_v11, %v367_v11  ;;  %v1568_v11 = vld [vmem:[#allocation8 + $0x20] sm:$0xff] }
 0x417   :  { %v370_v25 = vpack.c.bf16 %v366_v19, %v366_v19 }
 0x418   :  { %1435 = vmatmul.msk.bf16.vlgmr.msrb.gmra.mxu3 %vm324_vm9, %v371_v13 }
 0x41b   :  { %v1662_v17 = vpop.eup %1661 }
 0x41c   :  { %v360_v14 = vpop.xlane.xlu2 %359  ;;  %v365_v23 = vmul.f32 %v1662_v17, %v1654_v2 }
 0x41d   :  { %1663 = vrcp.f32 %v360_v14 }
 0x41e   :  { %v369_v29 = vpack.c.bf16 %v365_v23, %v365_v23 }
 0x41f   :  { %v438_v6 = vpop.permute.xlu0 %437 }
 0x420   :  { %v443_v62 = vsel %vm378_vm10, %v438_v6, 0 }
 0x421   :  { %452 = vmatpush.bf16.msrb.mxu0 %v443_v62 }
 0x423   :  { %v1664_v60 = vpop.eup %1663 }
 0x424   :  { %v368_v20 = vmul.f32 %v1664_v60, %v1656_v4  ;;  %v396_v21 = vpop.permute.xlu2 %395 }
 0x425   :  { %v401_v22 = vsel %vm378_vm10, %v396_v21, 0 }
 0x426   :  { %410 = vmatpush.bf16.msra.mxu2 %v401_v22  ;;  %v372_v24 = vpack.c.bf16 %v368_v20, %v368_v20 }
 0x427   :  { %v374_v26 = vpop.permute.xlu0 %373 }
 0x428   :  { %1436 = vmatmul.msk.bf16.vlgmr.msrb.gmra.mxu0 %vm324_vm9, %v372_v24  ;;  %v380_v27 = vsel %vm378_vm10, %v374_v26, 0 }
 0x429   :  { %389 = vmatpush.bf16.msrb.mxu1 %v380_v27  ;;  %1434 = vmatmul.msk.bf16.vlgmr.msra.gmra.mxu2 %vm324_vm9, %v370_v25  ;;  %v1628_v27 = vld [vmem:[#allocation10 + $0x20] ss:$0 sm:$0xff] }
 0x42c   :  { %1433 = vmatmul.msk.bf16.vlgmr.msrb.gmra.mxu1 %vm324_vm9, %v369_v29 }
 0x42d   :  { %496 = vmatpush.bf16.msra.mxu1 %v1567_v30 }
 0x431   :  { %497 = vmatpush.bf16.msra.mxu1 %v1566_v42  ;;  %v1576_v42 = vld [vmem:[#allocation8 + $0x60] sm:$0xff] }
 0x49b   :  { %v433_v32 = vpop.f32.mrf.mxu3 }
 0x4a3   :  { %v435_v33 = vpop.f32.mrf.mxu3 }
 0x4a4   :  { %v1629_v33 = vld [vmem:[#allocation10 + $0x28] ss:$0 sm:$0xff] }
 0x4a5   :  { %v454_v34 = vpop.f32.mrf.mxu0 }
 0x4a6   :  { %v1609_v35 = vpack.i.bf16 %v454_v34, %v433_v32 }
 0x4a8   :  { %1610 = vrot.lane.b32.xlu1 %v1609_v35, %s1874_s20 }
 0x4a9   :  { %v391_v36 = vpop.f32.mrf.mxu1 }
 0x4ac   :  { %v412_v37 = vpop.f32.mrf.mxu2 }
 0x4ad   :  { %v456_v39 = vpop.f32.mrf.mxu0 }
 0x4b1   :  { %v393_v40 = vpop.f32.mrf.mxu1 }
 0x4b4   :  { %v414_v41 = vpop.f32.mrf.mxu2 }
 0x4b5   :  { %v1577_v41 = vld [vmem:[#allocation8 + $0x68] sm:$0xff] }
 0x4b6   :  { %679 = vmatpush.bf16.msra.mxu3 %v1577_v41 }
 0x4ba   :  { %680 = vmatpush.bf16.msra.mxu3 %v1576_v42 }
 0x51a   :  { %v1611_v43 = vpop.permute.xlu1 %1610 }
 0x51b   :  { %v1613_v44 = vunpack.i.h.bf16 %v1611_v43  ;;  %v1612_v45 = vunpack.i.l.bf16 %v1611_v43  ;;  %v1575_v43 = vld [vmem:[#allocation8 + $0x58] sm:$0xff] }
 0x51c   :  { %681 = vmatpush.bf16.msra.mxu3 %v1575_v43 }
 0x51d   :  { %v467_v46 = vsel %vm216_vm8, %v412_v37, %v1613_v44  ;;  %v466_v47 = vsel %vm216_vm8, %v391_v36, %v1612_v45  ;;  %v1574_v44 = vld [vmem:[#allocation8 + $0x50] sm:$0xff]  ;;  %v1573_v45 = vld [vmem:[#allocation8 + $0x48] sm:$0xff] }
 0x51e   :  { %v468_v48 = vpack.c.bf16 %v467_v46, %v466_v47  ;;  %v1572_v46 = vld [vmem:[#allocation8 + $0x40] sm:$0xff]  ;;  %v1571_v47 = vld [vmem:[#allocation8 + $0x38] sm:$0xff] }
 0x520   :  { %1445 = vmatmul.msk.bf16.vlgmr.msra.gmra.mxu1 %vm105_vm0, %v468_v48  ;;  %682 = vmatpush.bf16.msra.mxu3 %v1574_v44  ;;  %v1630_v48 = vld [vmem:[#allocation10 + $0x30] ss:$0 sm:$0xff] }
 0x524   :  { %683 = vmatpush.bf16.msra.mxu3 %v1573_v45 }
 0x528   :  { %684 = vmatpush.bf16.msra.mxu3 %v1572_v46 }
 0x52c   :  { %685 = vmatpush.bf16.msra.mxu3 %v1571_v47 }
 0x59d   :  { %v499_v52 = vpop.f32.mrf.mxu1 }
 0x59e   :  { %v500_v53 = vadd.f32 %v1627_v51, %v499_v52 }
 0x5a0   :  { %v504_v54 = vadd.f32 %v500_v53, %v1931_v49 }
 0x5a2   :  { %v508_v55 = vsel %vm105_vm0, %v504_v54, 0.0 }
 0x5a3   :  { %509 = vadd.xlane.f32.xlu0 %v508_v55 }
 0x5a5   :  { %v501_v56 = vpop.f32.mrf.mxu1 }
 0x5a6   :  { %v502_v57 = vadd.f32 %v1627_v51, %v501_v56  ;;  %v1570_v51 = vld [vmem:[#allocation8 + $0x30] sm:$0xff] }
 0x5a7   :  { %686 = vmatpush.bf16.msra.mxu3 %v1570_v51 }
 0x5a8   :  { %v505_v58 = vadd.f32 %v502_v57, %v1933_v50  ;;  %v1569_v50 = vld [vmem:[#allocation8 + $0x28] sm:$0xff] }
 0x5a9   :  { %586 = vmatpush.bf16.msrb.mxu2 %v1569_v50 }
 0x5aa   :  { %v511_v59 = vsel %vm105_vm0, %v505_v58, 0.0 }
 0x5ab   :  { %512 = vadd.xlane.f32.xlu1 %v511_v59 }
 0x5ad   :  { %587 = vmatpush.bf16.msrb.mxu2 %v1568_v11 }
 0x616   :  { %v510_v61 = vpop.xlane.xlu0 %509 }
 0x617   :  { %v514_v63 = vmul.f32 %v510_v61, %v1923_v10 }
 0x619   :  { %v516_v0 = vsub.f32 %v504_v54, %v514_v63 }
 0x61b   :  { %v518_v1 = vmul.f32 %v516_v0, %v516_v0 }
 0x61d   :  { %v520_v2 = vsel %vm105_vm0, %v518_v1, 0.0 }
 0x61e   :  { %v513_v3 = vpop.xlane.xlu1 %512  ;;  %521 = vadd.xlane.f32.xlu2 %v520_v2 }
 0x61f   :  { %v515_v49 = vmul.f32 %v513_v3, %v1923_v10 }
 0x621   :  { %v517_v4 = vsub.f32 %v505_v58, %v515_v49 }
 0x623   :  { %v519_v5 = vmul.f32 %v517_v4, %v517_v4 }
 0x625   :  { %v523_v7 = vsel %vm105_vm0, %v519_v5, 0.0 }
 0x626   :  { %524 = vadd.xlane.f32.xlu0 %v523_v7 }
 0x691   :  { %v522_v8 = vpop.xlane.xlu2 %521 }
 0x692   :  { %v526_v9 = vmul.f32 %v522_v8, %v1923_v10 }
 0x694   :  { %v528_v12 = vadd.f32 1e-12, %v526_v9 }
 0x696   :  { %1665 = vrsqrt.f32 %v528_v12  ;;  %vm536_vm12 = vweird.f32 %v528_v12 }
 0x699   :  { %v525_v13 = vpop.xlane.xlu0 %524 }
 0x69a   :  { %v527_v14 = vmul.f32 %v525_v13, %v1923_v10  ;;  %v1631_v13 = vld [vmem:[#allocation10 + $0x38] ss:$0 sm:$0xff] }
 0x69c   :  { %v1666_v6 = vpop.eup %1665  ;;  %v529_v15 = vadd.f32 1e-12, %v527_v14 }
 0x69d   :  { %v531_v62 = vmul.f32 %v1666_v6, %v528_v12  ;;  %vm537_vm11 = vweird.f32 %v1666_v6 }
 0x69e   :  { %1667 = vrsqrt.f32 %v529_v15  ;;  %vm538_vm13 = vmor %vm536_vm12, %vm537_vm11  ;;  %vm546_vm15 = vweird.f32 %v529_v15 }
 0x69f   :  { %v532_v17 = vmul.f32 %v1666_v6, %v531_v62 }
 0x6a1   :  { %v533_v60 = vmul.f32 0.5, %v532_v17 }
 0x6a3   :  { %v534_v19 = vsub.f32 1.5, %v533_v60 }
 0x6a4   :  { %v1668_v20 = vpop.eup %1667 }
 0x6a5   :  { %v535_v21 = vmul.f32 %v1666_v6, %v534_v19  ;;  %v541_v22 = vmul.f32 %v1668_v20, %v529_v15  ;;  %vm547_vm14 = vweird.f32 %v1668_v20 }
 0x6a6   :  { %vm548_vm1 = vmor %vm546_vm15, %vm547_vm14 }
 0x6a7   :  { %v542_v23 = vmul.f32 %v1668_v20, %v541_v22  ;;  %v539_v24 = vsel %vm538_vm13, %v1666_v6, %v535_v21 }
 0x6a8   :  { %v550_v29 = vmul.f32 %v539_v24, %v516_v0 }
 0x6a9   :  { %v543_v25 = vmul.f32 0.5, %v542_v23 }
 0x6aa   :  { %v553_v34 = vmul.f32 %v1628_v27, %v550_v29 }
 0x6ab   :  { %v544_v26 = vsub.f32 1.5, %v543_v25 }
 0x6ac   :  { %v556_v37 = vadd.f32 %v1629_v33, %v553_v34 }
 0x6ad   :  { %v545_v30 = vmul.f32 %v1668_v20, %v544_v26 }
 0x6af   :  { %v549_v32 = vsel %vm548_vm1, %v1668_v20, %v545_v30 }
 0x6b0   :  { %v551_v35 = vmul.f32 %v549_v32, %v517_v4 }
 0x6b2   :  { %v554_v36 = vmul.f32 %v1628_v27, %v551_v35 }
 0x6b4   :  { %v557_v39 = vadd.f32 %v1629_v33, %v554_v36  ;;  %v1579_v33 = vld [vmem:[#allocation8 + $0x78] sm:$0xff]  ;;  %v1578_v36 = vld [vmem:[#allocation8 + $0x70] sm:$0xff] }
 0x6b5   :  { %775 = vmatpush.bf16.msra.mxu0 %v1579_v33 }
 0x6b6   :  { %v558_v40 = vpack.c.bf16 %v557_v39, %v556_v37 }
 0x6b8   :  { %1454 = vmatmul.msk.bf16.vlgmr.msrb.gmra.mxu2 %vm105_vm0, %v558_v40 }
 0x6b9   :  { %776 = vmatpush.bf16.msra.mxu0 %v1578_v36 }
 0x73b   :  { %v589_v52 = vpop.f32.mrf.mxu2 }
 0x73c   :  { %v590_v53 = vadd.f32 %v1630_v48, %v589_v52 }
 0x73e   :  { %v594_v54 = vmul.f32 %v590_v53, %v590_v53 }
 0x740   :  { %v596_v55 = vmul.f32 %v594_v54, %v590_v53 }
 0x742   :  { %v598_v56 = vmul.f32 0.044715, %v596_v55 }
 0x743   :  { %v591_v57 = vpop.f32.mrf.mxu2 }
 0x744   :  { %v600_v58 = vadd.f32 %v598_v56, %v590_v53  ;;  %v592_v59 = vadd.f32 %v1630_v48, %v591_v57  ;;  %v1632_v56 = vld [vmem:[#allocation10 + $0x40] ss:$0 sm:$0xff] }
 0x746   :  { %v602_v61 = vmul.f32 0.7978846, %v600_v58  ;;  %v595_v63 = vmul.f32 %v592_v59, %v592_v59 }
 0x748   :  { %v597_v0 = vmul.f32 %v595_v63, %v592_v59  ;;  %1669 = vtanh.f32 %v602_v61  ;;  %v1633_v61 = vld [vmem:[#allocation10 + $0x48] ss:$0 sm:$0xff] }
 0x74a   :  { %v599_v1 = vmul.f32 0.044715, %v597_v0 }
 0x74c   :  { %v601_v2 = vadd.f32 %v599_v1, %v592_v59 }
 0x74e   :  { %v603_v3 = vmul.f32 0.7978846, %v601_v2  ;;  %v1670_v49 = vpop.eup %1669 }
 0x74f   :  { %v606_v4 = vadd.f32 1.0, %v1670_v49 }
 0x750   :  { %1671 = vtanh.f32 %v603_v3 }
 0x751   :  { %v608_v7 = vmul.f32 0.5, %v606_v4  ;;  %v1634_v4 = vld [vmem:[#allocation10 + $0x50] ss:$0 sm:$0xff] }
 0x753   :  { %v610_v9 = vmul.f32 %v608_v7, %v590_v53 }
 0x756   :  { %v1672_v5 = vpop.eup %1671 }
 0x757   :  { %v607_v50 = vadd.f32 1.0, %v1672_v5 }
 0x759   :  { %v609_v8 = vmul.f32 0.5, %v607_v50 }
 0x75b   :  { %v611_v11 = vmul.f32 %v609_v8, %v592_v59 }
 0x75d   :  { %v612_v12 = vpack.c.bf16 %v611_v11, %v610_v9 }
 0x75f   :  { %687 = vmatmul.bf16.vlgmr.msra.gmra.mxu3 %v612_v12 }
 0x7e2   :  { %v688_v14 = vpop.f32.mrf.mxu3 }
 0x7e3   :  { %v689_v6 = vadd.f32 %v1631_v13, %v688_v14 }
 0x7e5   :  { %v693_v15 = vadd.f32 %v689_v6, %v556_v37 }
 0x7e7   :  { %v697_v62 = vsel %vm105_vm0, %v693_v15, 0.0 }
 0x7e8   :  { %698 = vadd.xlane.f32.xlu1 %v697_v62 }
 0x7ea   :  { %v690_v17 = vpop.f32.mrf.mxu3 }
 0x7eb   :  { %v691_v60 = vadd.f32 %v1631_v13, %v690_v17 }
 0x7ed   :  { %v694_v19 = vadd.f32 %v691_v60, %v557_v39 }
 0x7ef   :  { %v700_v20 = vsel %vm105_vm0, %v694_v19, 0.0 }
 0x7f0   :  { %701 = vadd.xlane.f32.xlu0 %v700_v20 }
 0x85b   :  { %v699_v21 = vpop.xlane.xlu1 %698 }
 0x85c   :  { %v703_v22 = vmul.f32 %v699_v21, %v1923_v10 }
 0x85e   :  { %v705_v23 = vsub.f32 %v693_v15, %v703_v22 }
 0x860   :  { %v707_v24 = vmul.f32 %v705_v23, %v705_v23 }
 0x862   :  { %v709_v25 = vsel %vm105_vm0, %v707_v24, 0.0 }
 0x863   :  { %v702_v26 = vpop.xlane.xlu0 %701  ;;  %710 = vadd.xlane.f32.xlu1 %v709_v25 }
 0x864   :  { %v704_v27 = vmul.f32 %v702_v26, %v1923_v10 }
 0x866   :  { %v706_v29 = vsub.f32 %v694_v19, %v704_v27 }
 0x868   :  { %v708_v30 = vmul.f32 %v706_v29, %v706_v29 }
 0x86a   :  { %v712_v32 = vsel %vm105_vm0, %v708_v30, 0.0 }
 0x86b   :  { %713 = vadd.xlane.f32.xlu2 %v712_v32 }
 0x8d6   :  { %v711_v34 = vpop.xlane.xlu1 %710 }
 0x8d7   :  { %v715_v35 = vmul.f32 %v711_v34, %v1923_v10 }
 0x8d9   :  { %v717_v37 = vadd.f32 1e-12, %v715_v35 }
 0x8db   :  { %1673 = vrsqrt.f32 %v717_v37  ;;  %vm725_vm3 = vweird.f32 %v717_v37 }
 0x8de   :  { %v714_v39 = vpop.xlane.xlu2 %713 }
 0x8df   :  { %v716_v40 = vmul.f32 %v714_v39, %v1923_v10 }
 0x8e1   :  { %v1674_v41 = vpop.eup %1673  ;;  %v718_v42 = vadd.f32 1e-12, %v716_v40 }
 0x8e2   :  { %v720_v43 = vmul.f32 %v1674_v41, %v717_v37  ;;  %vm726_vm2 = vweird.f32 %v1674_v41 }
 0x8e3   :  { %1675 = vrsqrt.f32 %v718_v42  ;;  %vm727_vm4 = vmor %vm725_vm3, %vm726_vm2  ;;  %vm735_vm6 = vweird.f32 %v718_v42 }
 0x8e4   :  { %v721_v44 = vmul.f32 %v1674_v41, %v720_v43 }
 0x8e6   :  { %v722_v45 = vmul.f32 0.5, %v721_v44 }
 0x8e8   :  { %v723_v46 = vsub.f32 1.5, %v722_v45 }
 0x8e9   :  { %v1676_v47 = vpop.eup %1675 }
 0x8ea   :  { %v724_v48 = vmul.f32 %v1674_v41, %v723_v46  ;;  %v730_v51 = vmul.f32 %v1676_v47, %v718_v42  ;;  %vm736_vm5 = vweird.f32 %v1676_v47 }
 0x8eb   :  { %vm737_vm7 = vmor %vm735_vm6, %vm736_vm5  ;;  %vm1342_vm5 = vcmask 1041409  }
 0x8ec   :  { %v731_v52 = vmul.f32 %v1676_v47, %v730_v51  ;;  %v728_v53 = vsel %vm727_vm4, %v1674_v41, %v724_v48 }
 0x8ed   :  { %v739_v57 = vmul.f32 %v728_v53, %v705_v23 }
 0x8ee   :  { %v732_v54 = vmul.f32 0.5, %v731_v52 }
 0x8ef   :  { %v742_v63 = vmul.f32 %v1632_v56, %v739_v57 }
 0x8f0   :  { %v733_v55 = vsub.f32 1.5, %v732_v54 }
 0x8f1   :  { %v2024_v2 = vadd.f32 %v1633_v61, %v742_v63 }
 0x8f2   :  { %v734_v58 = vmul.f32 %v1676_v47, %v733_v55 }
 0x8f4   :  { %v738_v59 = vsel %vm737_vm7, %v1676_v47, %v734_v58 }
 0x8f5   :  { %v740_v0 = vmul.f32 %v738_v59, %v706_v29 }
 0x8f7   :  { %v743_v1 = vmul.f32 %v1632_v56, %v740_v0 }
 0x8f9   :  { %v2026_v3 = vadd.f32 %v1633_v61, %v743_v1 }
 0x8fb   :  { %v747_v49 = vpack.c.bf16 %v2026_v3, %v2024_v2 }
 0x8fd   :  { %1495 = vmatmul.msk.bf16.vlgmr.msra.gmra.mxu0 %vm105_vm0, %v747_v49 }
 0x97a   :  { %v778_v5 = vpop.f32.mrf.mxu0 }
 0x97b   :  { %v779_v7 = vadd.f32 %v1634_v4, %v778_v5 }
 0x97d   :  { %v791_v50 = vpack.c.bf16 %v779_v7, %v779_v7 }
 0x97f   :  { %v796_v8 = vunpack.c.l.b16 %v791_v50 }
 0x981   :  { %v2031_v9 = vpack.c.b16 %v796_v8, %v796_v8 }
 0x982   :  { %v780_v11 = vpop.f32.mrf.mxu0 }
 0x983   :  { %v781_v12 = vadd.f32 %v1634_v4, %v780_v11  ;;  %798 = vrot.lane.b32.xlu1 %v2031_v9, %s1872_s4 }
 0x985   :  { %v792_v13 = vpack.c.bf16 %v781_v12, %v781_v12  ;;  %v1614_v14 = vpack.i.bf16 %v781_v12, %v779_v7 }
 0x987   :  { %1615 = vrot.lane.b32.xlu0 %v1614_v14, %s1871_s2  ;;  %v820_v6 = vunpack.c.l.b16 %v792_v13 }
 0x989   :  { %v2036_v15 = vpack.c.b16 %v820_v6, %v820_v6 }
 0x98b   :  { %822 = vrot.lane.b32.xlu1 %v2036_v15, %s1872_s4 }
 0x9f5   :  { %v799_v62 = vpop.permute.xlu1 %798 }
 0x9f6   :  { %v804_v17 = vsel %vm216_vm8, %v799_v62, 0 }
 0x9f7   :  { %813 = vmatpush.bf16.xpose.msrb.mxu1 %v804_v17 }
 0x9f9   :  { %v1616_v60 = vpop.permute.xlu0 %1615 }
 0x9fa   :  { %v1618_v19 = vunpack.i.h.bf16 %v1616_v60  ;;  %v1617_v20 = vunpack.i.l.bf16 %v1616_v60 }
 0x9fc   :  { %v794_v21 = vpack.c.bf16 %v1618_v19, %v1618_v19  ;;  %v793_v22 = vpack.c.bf16 %v1617_v20, %v1617_v20 }
 0x9fd   :  { %v823_v23 = vpop.permute.xlu1 %822 }
 0x9fe   :  { %v868_v24 = vunpack.c.l.b16 %v794_v21  ;;  %v844_v25 = vunpack.c.l.b16 %v793_v22  ;;  %v828_v26 = vsel %vm216_vm8, %v823_v23, 0  ;;  %1496 = vmatmul.msk.bf16.vlgmr.msrb.gmra.mxu1 %vm216_vm8, %v791_v50 }
 0x9ff   :  { %837 = vmatpush.bf16.xpose.msra.mxu2 %v828_v26 }
 0xa00   :  { %v2043_v27 = vpack.c.b16 %v868_v24, %v868_v24  ;;  %v845_v29 = vpack.c.b16 %v844_v25, %v844_v25 }
 0xa02   :  { %870 = vrot.lane.b32.xlu0 %v2043_v27, %s1872_s4  ;;  %846 = vrot.lane.b32.xlu2 %v845_v29, %s1872_s4 }
 0xa06   :  { %1497 = vmatmul.msk.bf16.vlgmr.msra.gmra.mxu2 %vm216_vm8, %v792_v13 }
 0xa5c   :  { %v847_v30 = vpop.permute.xlu2 %846 }
 0xa5d   :  { %v852_v32 = vsel %vm216_vm8, %v847_v30, 0 }
 0xa5e   :  { %861 = vmatpush.bf16.xpose.msrb.mxu0 %v852_v32 }
 0xa65   :  { %1498 = vmatmul.msk.bf16.vlgmr.msrb.gmra.mxu0 %vm216_vm8, %v793_v22 }
 0xa74   :  { %v871_v33 = vpop.permute.xlu0 %870 }
 0xa75   :  { %v876_v34 = vsel %vm216_vm8, %v871_v33, 0 }
 0xa76   :  { %885 = vmatpush.bf16.xpose.msra.mxu1 %v876_v34 }
 0xa7b   :  { %v815_v35 = vpop.f32.mrf.mxu1 }
 0xa7c   :  { %v891_v36 = vmul.f32 0.25, %v815_v35 }
 0xa7d   :  { %1499 = vmatmul.msk.bf16.vlgmr.msra.gmra.mxu1 %vm216_vm8, %v794_v21 }
 0xa7e   :  { %v895_v37 = vadd.f32 %v891_v36, %v312_v38 }
 0xa80   :  { %v899_v39 = vsel %vm324_vm9, %v895_v37, -inf }
 0xa81   :  { %900 = vmax.xlane.f32.xlu1 %v899_v39 }
 0xa83   :  { %v817_v40 = vpop.f32.mrf.mxu1 }
 0xa89   :  { %v839_v41 = vpop.f32.mrf.mxu2 }
 0xa8a   :  { %v892_v46 = vmul.f32 0.25, %v839_v41 }
 0xa8c   :  { %v896_v51 = vadd.f32 %v892_v46, %v1964_v18 }
 0xa8e   :  { %v902_v16 = vsel %vm324_vm9, %v896_v51, -inf }
 0xa91   :  { %v841_v42 = vpop.f32.mrf.mxu2 }
 0xae2   :  { %v863_v43 = vpop.f32.mrf.mxu0 }
 0xae3   :  { %v893_v44 = vmul.f32 0.25, %v863_v43  ;;  %v1581_v43 = vld [vmem:[#allocation8 + $0x88] sm:$0xff] }
 0xae5   :  { %v897_v45 = vadd.f32 %v893_v44, %v1971_v28 }
 0xae7   :  { %v905_v47 = vsel %vm324_vm9, %v897_v45, -inf }
 0xae8   :  { %906 = vmax.xlane.f32.xlu0 %v905_v47 }
 0xaea   :  { %v865_v48 = vpop.f32.mrf.mxu0 }
 0xaf0   :  { %903 = vmax.xlane.f32.xlu0 %v902_v16 }
 0xaf4   :  { %v901_v38 = vpop.xlane.xlu1 %900 }
 0xaf5   :  { %v911_v52 = vsub.f32 %v895_v37, %v901_v38 }
 0xaf7   :  { %v915_v53 = vmul.f32 1.442695, %v911_v52 }
 0xaf9   :  { %1677 = vpow2.f32 %v915_v53 }
 0xafa   :  { %v887_v54 = vpop.f32.mrf.mxu1 }
 0xafb   :  { %v894_v55 = vmul.f32 0.25, %v887_v54 }
 0xafd   :  { %v898_v56 = vadd.f32 %v894_v55, %v1973_v31 }
 0xaff   :  { %v1678_v57 = vpop.eup %1677  ;;  %v908_v28 = vsel %vm324_vm9, %v898_v56, -inf }
 0xb00   :  { %909 = vmax.xlane.f32.xlu2 %v908_v28  ;;  %v923_v58 = vsel %vm324_vm9, %v1678_v57, 0.0 }
 0xb01   :  { %924 = vadd.xlane.f32.xlu1 %v923_v58 }
 0xb02   :  { %v889_v59 = vpop.f32.mrf.mxu1 }
 0xb04   :  { %989 = vrot.lane.b32.xlu0 %v845_v29, %s1873_s19 }
 0xb0c   :  { %947 = vrot.lane.b32.xlu0 %v2031_v9, %s1873_s19 }
 0xb5b   :  { %v907_v18 = vpop.xlane.xlu0 %906 }
 0xb5c   :  { %v913_v61 = vsub.f32 %v897_v45, %v907_v18 }
 0xb5e   :  { %v919_v63 = vmul.f32 1.442695, %v913_v61 }
 0xb60   :  { %1679 = vpow2.f32 %v919_v63 }
 0xb63   :  { %v904_v0 = vpop.xlane.xlu0 %903 }
 0xb64   :  { %v912_v1 = vsub.f32 %v896_v51, %v904_v0  ;;  %v1580_v51 = vld [vmem:[#allocation8 + $0x80] sm:$0xff] }
 0xb66   :  { %v1680_v31 = vpop.eup %1679  ;;  %v917_v49 = vmul.f32 1.442695, %v912_v1 }
 0xb67   :  { %v929_v4 = vsel %vm324_vm9, %v1680_v31, 0.0 }
 0xb68   :  { %1681 = vpow2.f32 %v917_v49  ;;  %930 = vadd.xlane.f32.xlu2 %v929_v4 }
 0xb6e   :  { %v1682_v5 = vpop.eup %1681 }
 0xb6f   :  { %v926_v7 = vsel %vm324_vm9, %v1682_v5, 0.0 }
 0xb70   :  { %927 = vadd.xlane.f32.xlu1 %v926_v7 }
 0xb73   :  { %v910_v50 = vpop.xlane.xlu2 %909 }
 0xb74   :  { %v914_v8 = vsub.f32 %v898_v56, %v910_v50  ;;  %v925_v11 = vpop.xlane.xlu1 %924  ;;  %v1635_v56 = vld [vmem:[#allocation10 + $0x58] ss:$0 sm:$0xff] }
 0xb75   :  { %1683 = vrcp.f32 %v925_v11 }
 0xb76   :  { %v921_v9 = vmul.f32 1.442695, %v914_v8  ;;  %v990_v12 = vpop.permute.xlu0 %989 }
 0xb77   :  { %v995_v13 = vsel %vm378_vm10, %v990_v12, 0 }
 0xb78   :  { %1685 = vpow2.f32 %v921_v9  ;;  %1004 = vmatpush.bf16.msra.mxu0 %v995_v13  ;;  %v1582_v13 = vld [vmem:[#allocation8 + $0x90] sm:$0xff] }
 0xb7b   :  { %v1684_v14 = vpop.eup %1683 }
 0xb7c   :  { %v939_v6 = vmul.f32 %v1684_v14, %v1678_v57 }
 0xb7e   :  { %v1686_v62 = vpop.eup %1685  ;;  %v948_v17 = vpop.permute.xlu0 %947  ;;  %v943_v20 = vpack.c.bf16 %v939_v6, %v939_v6 }
 0xb7f   :  { %v953_v60 = vsel %vm378_vm10, %v948_v17, 0  ;;  %v932_v19 = vsel %vm324_vm9, %v1686_v62, 0.0 }
 0xb80   :  { %1010 = vrot.lane.b32.xlu2 %v2043_v27, %s1873_s19  ;;  %962 = vmatpush.bf16.msrb.mxu2 %v953_v60 }
 0xb81   :  { %933 = vadd.xlane.f32.xlu1 %v932_v19 }
 0xb83   :  { %1500 = vmatmul.msk.bf16.vlgmr.msrb.gmra.mxu2 %vm324_vm9, %v943_v20 }
 0xb84   :  { %1069 = vmatpush.bf16.msra.mxu2 %v1581_v43  ;;  %v1591_v43 = vld [vmem:[#allocation8 + $0xd8] sm:$0xff] }
 0xb85   :  { %1252 = vmatpush.bf16.msrb.mxu0 %v1591_v43 }
 0xb88   :  { %1070 = vmatpush.bf16.msra.mxu2 %v1580_v51  ;;  %v1585_v51 = vld [vmem:[#allocation8 + $0xa8] sm:$0xff] }
 0xb9a   :  { %968 = vrot.lane.b32.xlu1 %v2036_v15, %s1873_s19 }
 0xbdb   :  { %v931_v21 = vpop.xlane.xlu2 %930 }
 0xbdc   :  { %1687 = vrcp.f32 %v931_v21 }
 0xbe2   :  { %v1688_v22 = vpop.eup %1687 }
 0xbe3   :  { %v941_v23 = vmul.f32 %v1688_v22, %v1680_v31  ;;  %v1011_v24 = vpop.permute.xlu2 %1010  ;;  %v928_v27 = vpop.xlane.xlu1 %927 }
 0xbe4   :  { %v1016_v25 = vsel %vm378_vm10, %v1011_v24, 0 }
 0xbe5   :  { %v945_v26 = vpack.c.bf16 %v941_v23, %v941_v23  ;;  %1025 = vmatpush.bf16.msrb.mxu1 %v1016_v25 }
 0xbe7   :  { %1502 = vmatmul.msk.bf16.vlgmr.msra.gmra.mxu0 %vm324_vm9, %v945_v26 }
 0xbf4   :  { %v934_v29 = vpop.xlane.xlu1 %933 }
 0xbf5   :  { %1689 = vrcp.f32 %v934_v29 }
 0xbf6   :  { %1691 = vrcp.f32 %v928_v27 }
 0xbfb   :  { %v1690_v30 = vpop.eup %1689 }
 0xbfc   :  { %v942_v32 = vmul.f32 %v1690_v30, %v1686_v62  ;;  %v1692_v34 = vpop.eup %1691 }
 0xbfd   :  { %v940_v35 = vmul.f32 %v1692_v34, %v1682_v5 }
 0xbfe   :  { %v946_v33 = vpack.c.bf16 %v942_v32, %v942_v32  ;;  %v1636_v32 = vld [vmem:[#allocation10 + $0x60] ss:$0 sm:$0xff] }
 0xbff   :  { %v944_v40 = vpack.c.bf16 %v940_v35, %v940_v35  ;;  %v1637_v35 = vld [vmem:[#allocation10 + $0x68] ss:$0 sm:$0xff] }
 0xc00   :  { %1503 = vmatmul.msk.bf16.vlgmr.msrb.gmra.mxu1 %vm324_vm9, %v946_v33 }
 0xc06   :  { %v964_v15 = vpop.f32.mrf.mxu2 }
 0xc0c   :  { %v969_v36 = vpop.permute.xlu1 %968 }
 0xc0d   :  { %v974_v37 = vsel %vm378_vm10, %v969_v36, 0 }
 0xc0e   :  { %983 = vmatpush.bf16.msrb.mxu3 %v974_v37  ;;  %v966_v39 = vpop.f32.mrf.mxu2 }
 0xc11   :  { %1501 = vmatmul.msk.bf16.vlgmr.msrb.gmra.mxu3 %vm324_vm9, %v944_v40 }
 0xc64   :  { %v1006_v41 = vpop.f32.mrf.mxu0 }
 0xc6c   :  { %v1008_v42 = vpop.f32.mrf.mxu0 }
 0xc7d   :  { %v1027_v44 = vpop.f32.mrf.mxu1 }
 0xc7e   :  { %v1619_v45 = vpack.i.bf16 %v1027_v44, %v1006_v41  ;;  %v1590_v44 = vld [vmem:[#allocation8 + $0xd0] sm:$0xff] }
 0xc7f   :  { %1253 = vmatpush.bf16.msrb.mxu0 %v1590_v44 }
 0xc80   :  { %1620 = vrot.lane.b32.xlu2 %v1619_v45, %s1874_s20  ;;  %v1589_v45 = vld [vmem:[#allocation8 + $0xc8] sm:$0xff] }
 0xc83   :  { %1254 = vmatpush.bf16.msrb.mxu0 %v1589_v45 }
 0xc85   :  { %v1029_v46 = vpop.f32.mrf.mxu1 }
 0xc86   :  { %v1588_v46 = vld [vmem:[#allocation8 + $0xc0] sm:$0xff] }
 0xc87   :  { %1255 = vmatpush.bf16.msrb.mxu0 %v1588_v46 }
 0xc94   :  { %v985_v47 = vpop.f32.mrf.mxu3 }
 0xc9c   :  { %v987_v48 = vpop.f32.mrf.mxu3 }
 0xc9d   :  { %v1586_v48 = vld [vmem:[#allocation8 + $0xb0] sm:$0xff] }
 0xcda   :  { %v1621_v16 = vpop.permute.xlu2 %1620 }
 0xcdb   :  { %v1623_v38 = vunpack.i.h.bf16 %v1621_v16  ;;  %v1622_v52 = vunpack.i.l.bf16 %v1621_v16  ;;  %v1638_v16 = vld [vmem:[#allocation10 + $0x70] ss:$0 sm:$0xff] }
 0xcdd   :  { %v1039_v53 = vsel %vm216_vm8, %v964_v15, %v1622_v52  ;;  %v1040_v54 = vsel %vm216_vm8, %v985_v47, %v1623_v38  ;;  %v1587_v47 = vld [vmem:[#allocation8 + $0xb8] sm:$0xff]  ;;  %v1584_v38 = vld [vmem:[#allocation8 + $0xa0] sm:$0xff] }
 0xcde   :  { %v1041_v55 = vpack.c.bf16 %v1040_v54, %v1039_v53  ;;  %1256 = vmatpush.bf16.msrb.mxu0 %v1587_v47  ;;  %v1640_v47 = vld [vmem:[#allocation10 + $0x80] ss:$0 sm:$0xff] }
 0xce0   :  { %1512 = vmatmul.msk.bf16.vlgmr.msra.gmra.mxu2 %vm105_vm0, %v1041_v55 }
 0xce2   :  { %1257 = vmatpush.bf16.msrb.mxu0 %v1586_v48 }
 0xce6   :  { %1258 = vmatpush.bf16.msrb.mxu0 %v1585_v51  ;;  %v1641_v51 = vld [vmem:[#allocation10 + $0x88] ss:$0 sm:$0xff] }
 0xcea   :  { %1259 = vmatpush.bf16.msrb.mxu0 %v1584_v38 }
 0xd63   :  { %v1072_v57 = vpop.f32.mrf.mxu2 }
 0xd64   :  { %v1073_v28 = vadd.f32 %v1635_v56, %v1072_v57 }
 0xd66   :  { %v1077_v58 = vadd.f32 %v1073_v28, %v2024_v2 }
 0xd68   :  { %v1081_v59 = vsel %vm105_vm0, %v1077_v58, 0.0 }
 0xd69   :  { %1082 = vadd.xlane.f32.xlu0 %v1081_v59 }
 0xd6b   :  { %v1074_v18 = vpop.f32.mrf.mxu2 }
 0xd6c   :  { %v1075_v61 = vadd.f32 %v1635_v56, %v1074_v18 }
 0xd6e   :  { %v1078_v63 = vadd.f32 %v1075_v61, %v2026_v3  ;;  %v1583_v3 = vld [vmem:[#allocation8 + $0x98] sm:$0xff] }
 0xd6f   :  { %1159 = vmatpush.bf16.msra.mxu3 %v1583_v3  ;;  %v1639_v3 = vld [vmem:[#allocation10 + $0x78] ss:$0 sm:$0xff] }
 0xd70   :  { %v1084_v0 = vsel %vm105_vm0, %v1078_v63, 0.0 }
 0xd71   :  { %1085 = vadd.xlane.f32.xlu2 %v1084_v0 }
 0xd73   :  { %1160 = vmatpush.bf16.msra.mxu3 %v1582_v13 }
 0xddc   :  { %v1083_v1 = vpop.xlane.xlu0 %1082 }
 0xddd   :  { %v1087_v31 = vmul.f32 %v1083_v1, %v1923_v10 }
 0xddf   :  { %v1089_v49 = vsub.f32 %v1077_v58, %v1087_v31 }
 0xde1   :  { %v1091_v4 = vmul.f32 %v1089_v49, %v1089_v49 }
 0xde3   :  { %v1093_v5 = vsel %vm105_vm0, %v1091_v4, 0.0 }
 0xde4   :  { %v1086_v7 = vpop.xlane.xlu2 %1085  ;;  %1094 = vadd.xlane.f32.xlu1 %v1093_v5 }
 0xde5   :  { %v1088_v2 = vmul.f32 %v1086_v7, %v1923_v10 }
 0xde7   :  { %v1090_v50 = vsub.f32 %v1078_v63, %v1088_v2 }
 0xde9   :  { %v1092_v8 = vmul.f32 %v1090_v50, %v1090_v50 }
 0xdeb   :  { %v1096_v11 = vsel %vm105_vm0, %v1092_v8, 0.0 }
 0xdec   :  { %1097 = vadd.xlane.f32.xlu0 %v1096_v11 }
 0xe57   :  { %v1095_v9 = vpop.xlane.xlu1 %1094 }
 0xe58   :  { %v1099_v12 = vmul.f32 %v1095_v9, %v1923_v10 }
 0xe5a   :  { %v1101_v14 = vadd.f32 1e-12, %v1099_v12 }
 0xe5c   :  { %1693 = vrsqrt.f32 %v1101_v14  ;;  %vm1109_vm9 = vweird.f32 %v1101_v14 }
 0xe5f   :  { %v1098_v6 = vpop.xlane.xlu0 %1097 }
 0xe60   :  { %v1100_v62 = vmul.f32 %v1098_v6, %v1923_v10 }
 0xe62   :  { %v1694_v17 = vpop.eup %1693  ;;  %v1102_v60 = vadd.f32 1e-12, %v1100_v62 }
 0xe63   :  { %v1104_v19 = vmul.f32 %v1694_v17, %v1101_v14  ;;  %vm1110_vm8 = vweird.f32 %v1694_v17 }
 0xe64   :  { %1695 = vrsqrt.f32 %v1102_v60  ;;  %vm1111_vm10 = vmor %vm1109_vm9, %vm1110_vm8  ;;  %vm1119_vm12 = vweird.f32 %v1102_v60 }
 0xe65   :  { %v1105_v20 = vmul.f32 %v1694_v17, %v1104_v19 }
 0xe67   :  { %v1106_v21 = vmul.f32 0.5, %v1105_v20 }
 0xe69   :  { %v1107_v22 = vsub.f32 1.5, %v1106_v21 }
 0xe6a   :  { %v1696_v23 = vpop.eup %1695 }
 0xe6b   :  { %v1108_v24 = vmul.f32 %v1694_v17, %v1107_v22  ;;  %v1114_v25 = vmul.f32 %v1696_v23, %v1102_v60  ;;  %vm1120_vm11 = vweird.f32 %v1696_v23 }
 0xe6c   :  { %vm1121_vm13 = vmor %vm1119_vm12, %vm1120_vm11 }
 0xe6d   :  { %v1115_v26 = vmul.f32 %v1696_v23, %v1114_v25  ;;  %v1112_v27 = vsel %vm1111_vm10, %v1694_v17, %v1108_v24 }
 0xe6e   :  { %v1123_v33 = vmul.f32 %v1112_v27, %v1089_v49 }
 0xe6f   :  { %v1116_v29 = vmul.f32 0.5, %v1115_v26 }
 0xe70   :  { %v1126_v36 = vmul.f32 %v1636_v32, %v1123_v33 }
 0xe71   :  { %v1117_v30 = vsub.f32 1.5, %v1116_v29 }
 0xe72   :  { %v1129_v40 = vadd.f32 %v1637_v35, %v1126_v36 }
 0xe73   :  { %v1118_v15 = vmul.f32 %v1696_v23, %v1117_v30 }
 0xe75   :  { %v1122_v34 = vsel %vm1121_vm13, %v1696_v23, %v1118_v15 }
 0xe76   :  { %v1124_v37 = vmul.f32 %v1122_v34, %v1090_v50 }
 0xe78   :  { %v1127_v39 = vmul.f32 %v1636_v32, %v1124_v37 }
 0xe7a   :  { %v1130_v41 = vadd.f32 %v1637_v35, %v1127_v39 }
 0xe7c   :  { %v1131_v42 = vpack.c.bf16 %v1130_v41, %v1129_v40 }
 0xe7e   :  { %1521 = vmatmul.msk.bf16.vlgmr.msra.gmra.mxu3 %vm105_vm0, %v1131_v42  ;;  %v1592_v42 = vld [vmem:[#allocation8 + $0xe0] sm:$0xff] }
 0xf01   :  { %v1162_v52 = vpop.f32.mrf.mxu3 }
 0xf02   :  { %v1163_v53 = vadd.f32 %v1638_v16, %v1162_v52 }
 0xf04   :  { %v1167_v54 = vmul.f32 %v1163_v53, %v1163_v53 }
 0xf06   :  { %v1169_v55 = vmul.f32 %v1167_v54, %v1163_v53 }
 0xf08   :  { %v1171_v56 = vmul.f32 0.044715, %v1169_v55 }
 0xf09   :  { %v1164_v57 = vpop.f32.mrf.mxu3 }
 0xf0a   :  { %v1173_v28 = vadd.f32 %v1171_v56, %v1163_v53  ;;  %v1165_v58 = vadd.f32 %v1638_v16, %v1164_v57 }
 0xf0c   :  { %v1175_v59 = vmul.f32 0.7978846, %v1173_v28  ;;  %v1168_v18 = vmul.f32 %v1165_v58, %v1165_v58 }
 0xf0e   :  { %v1170_v61 = vmul.f32 %v1168_v18, %v1165_v58  ;;  %1697 = vtanh.f32 %v1175_v59 }
 0xf10   :  { %v1172_v63 = vmul.f32 0.044715, %v1170_v61 }
 0xf12   :  { %v1174_v0 = vadd.f32 %v1172_v63, %v1165_v58 }
 0xf14   :  { %v1176_v1 = vmul.f32 0.7978846, %v1174_v0  ;;  %v1698_v31 = vpop.eup %1697 }
 0xf15   :  { %v1179_v49 = vadd.f32 1.0, %v1698_v31 }
 0xf16   :  { %1699 = vtanh.f32 %v1176_v1 }
 0xf17   :  { %v1181_v5 = vmul.f32 0.5, %v1179_v49 }
 0xf19   :  { %v1183_v50 = vmul.f32 %v1181_v5, %v1163_v53 }
 0xf1c   :  { %v1700_v4 = vpop.eup %1699 }
 0xf1d   :  { %v1180_v7 = vadd.f32 1.0, %v1700_v4 }
 0xf1f   :  { %v1182_v2 = vmul.f32 0.5, %v1180_v7 }
 0xf21   :  { %v1184_v8 = vmul.f32 %v1182_v2, %v1165_v58 }
 0xf23   :  { %v1185_v11 = vpack.c.bf16 %v1184_v8, %v1183_v50 }
 0xf25   :  { %1260 = vmatmul.bf16.vlgmr.msrb.gmra.mxu0 %v1185_v11 }
 0xfa2   :  { %v1261_v9 = vpop.f32.mrf.mxu0 }
 0xfa3   :  { %v1262_v12 = vadd.f32 %v1639_v3, %v1261_v9 }
 0xfa5   :  { %v1266_v13 = vadd.f32 %v1262_v12, %v1129_v40  ;;  %v1593_v40 = vld [vmem:[#allocation8 + $0xe8] sm:$0xff] }
 0xfa6   :  { %1374 = vmatpush.bf16.msra.mxu1 %v1593_v40 }
 0xfa7   :  { %v1270_v14 = vsel %vm105_vm0, %v1266_v13, 0.0 }
 0xfa8   :  { %1271 = vadd.xlane.f32.xlu2 %v1270_v14 }
 0xfaa   :  { %v1263_v6 = vpop.f32.mrf.mxu0  ;;  %1375 = vmatpush.bf16.msra.mxu1 %v1592_v42 }
 0xfab   :  { %v1264_v62 = vadd.f32 %v1639_v3, %v1263_v6  ;;  %v1336_v3 = vld [vmem:[#allocation7] sm:$0x3] }
 0xfac   :  { %vm1337_vm6 = vcmp.ge.f32.partialorder %v1336_v3, 0.1 }
 0xfad   :  { %v1267_v17 = vadd.f32 %v1264_v62, %v1130_v41 }
 0xfaf   :  { %v1273_v60 = vsel %vm105_vm0, %v1267_v17, 0.0 }
 0xfb0   :  { %1274 = vadd.xlane.f32.xlu0 %v1273_v60 }
0x101b   :  { %v1272_v19 = vpop.xlane.xlu2 %1271 }
0x101c   :  { %v1276_v20 = vmul.f32 %v1272_v19, %v1923_v10 }
0x101e   :  { %v1278_v21 = vsub.f32 %v1266_v13, %v1276_v20 }
0x1020   :  { %v1280_v22 = vmul.f32 %v1278_v21, %v1278_v21 }
0x1022   :  { %v1282_v23 = vsel %vm105_vm0, %v1280_v22, 0.0 }
0x1023   :  { %v1275_v24 = vpop.xlane.xlu0 %1274  ;;  %1283 = vadd.xlane.f32.xlu2 %v1282_v23 }
0x1024   :  { %v1277_v25 = vmul.f32 %v1275_v24, %v1923_v10 }
0x1026   :  { %v1279_v26 = vsub.f32 %v1267_v17, %v1277_v25  ;;  %v1642_v17 = vld [vmem:[#allocation10 + $0x90] ss:$0 sm:$0xff] }
0x1028   :  { %v1281_v27 = vmul.f32 %v1279_v26, %v1279_v26 }
0x102a   :  { %v1285_v29 = vsel %vm105_vm0, %v1281_v27, 0.0 }
0x102b   :  { %1286 = vadd.xlane.f32.xlu0 %v1285_v29 }
0x1096   :  { %v1284_v30 = vpop.xlane.xlu2 %1283 }
0x1097   :  { %v1288_v32 = vmul.f32 %v1284_v30, %v1923_v10 }
0x1099   :  { %v1290_v33 = vadd.f32 1e-12, %v1288_v32 }
0x109b   :  { %1701 = vrsqrt.f32 %v1290_v33  ;;  %vm1298_vm15 = vweird.f32 %v1290_v33 }
0x109e   :  { %v1287_v15 = vpop.xlane.xlu0 %1286 }
0x109f   :  { %v1289_v34 = vmul.f32 %v1287_v15, %v1923_v10 }
0x10a1   :  { %v1702_v35 = vpop.eup %1701  ;;  %v1291_v36 = vadd.f32 1e-12, %v1289_v34 }
0x10a2   :  { %v1293_v37 = vmul.f32 %v1702_v35, %v1290_v33  ;;  %vm1299_vm14 = vweird.f32 %v1702_v35 }
0x10a3   :  { %1703 = vrsqrt.f32 %v1291_v36  ;;  %vm1300_vm1 = vmor %vm1298_vm15, %vm1299_vm14  ;;  %vm1308_vm3 = vweird.f32 %v1291_v36 }
0x10a4   :  { %v1294_v39 = vmul.f32 %v1702_v35, %v1293_v37 }
0x10a6   :  { %v1295_v41 = vmul.f32 0.5, %v1294_v39 }
0x10a8   :  { %v1296_v43 = vsub.f32 1.5, %v1295_v41 }
0x10a9   :  { %v1704_v44 = vpop.eup %1703 }
0x10aa   :  { %v1297_v45 = vmul.f32 %v1702_v35, %v1296_v43  ;;  %v1303_v46 = vmul.f32 %v1704_v44, %v1291_v36  ;;  %vm1309_vm2 = vweird.f32 %v1704_v44 }
0x10ab   :  { %vm1310_vm4 = vmor %vm1308_vm3, %vm1309_vm2 }
0x10ac   :  { %v1301_v48 = vsel %vm1300_vm1, %v1702_v35, %v1297_v45  ;;  %v1304_v10 = vmul.f32 %v1704_v44, %v1303_v46 }
0x10ad   :  { %v1312_v16 = vmul.f32 %v1301_v48, %v1278_v21 }
0x10ae   :  { %v1305_v38 = vmul.f32 0.5, %v1304_v10 }
0x10af   :  { %v1315_v52 = vmul.f32 %v1640_v47, %v1312_v16 }
0x10b0   :  { %v1306_v53 = vsub.f32 1.5, %v1305_v38 }
0x10b1   :  { %v1318_v54 = vadd.f32 %v1641_v51, %v1315_v52 }
0x10b2   :  { %v1307_v55 = vmul.f32 %v1704_v44, %v1306_v53 }
0x10b3   :  { %v1320_v56 = vmax.f32 %v1318_v54, 0.0 }
0x10b4   :  { %v1311_v57 = vsel %vm1310_vm4, %v1704_v44, %v1307_v55 }
0x10b5   :  { %v1322_v28 = vsel %vm105_vm0, %v1320_v56, -inf  ;;  %v1313_v58 = vmul.f32 %v1311_v57, %v1279_v26 }
0x10b6   :  { %v1323_v59 = vrot.slane %v1322_v28, 4 }
0x10b7   :  { %v1316_v18 = vmul.f32 %v1640_v47, %v1313_v58 }
0x10b8   :  { %v1324_v61 = vmax.f32 %v1322_v28, %v1323_v59 }
0x10b9   :  { %v1319_v63 = vadd.f32 %v1641_v51, %v1316_v18 }
0x10ba   :  { %v1325_v0 = vrot.slane %v1324_v61, 2 }
0x10bb   :  { %v1321_v1 = vmax.f32 %v1319_v63, 0.0 }
0x10bc   :  { %v1326_v49 = vmax.f32 %v1324_v61, %v1325_v0 }
0x10bd   :  { %v1329_v31 = vsel %vm105_vm0, %v1321_v1, -inf }
0x10be   :  { %v1330_v4 = vrot.slane %v1329_v31, 4  ;;  %v1327_v2 = vrot.slane %v1326_v49, 1 }
0x10c0   :  { %v1331_v5 = vmax.f32 %v1329_v31, %v1330_v4  ;;  %v1328_v8 = vmax.f32 %v1326_v49, %v1327_v2 }
0x10c2   :  { %v1332_v7 = vrot.slane %v1331_v5, 2  ;;  %v1338_v12 = vmul.f32 1.1111112, %v1328_v8 }
0x10c4   :  { %v1333_v50 = vmax.f32 %v1331_v5, %v1332_v7 }
0x10c6   :  { %v1334_v11 = vrot.slane %v1333_v50, 1 }
0x10c8   :  { %v1335_v9 = vmax.f32 %v1333_v50, %v1334_v11 }
0x10ca   :  { %v1339_v13 = vmul.f32 1.1111112, %v1335_v9 }
0x10cc   :  { %v1343_v14 = vsel %vm1342_vm5, %v1339_v13, %v1338_v12 }
0x10cd   :  { %v1345_v6 = vsel %vm1337_vm6, %v1343_v14, 0.0 }
0x10ce   :  { %v1346_v62 = vpack.c.bf16 %v1345_v6, %v1345_v6 }
0x10d0   :  { %1562 = vmatmul.msk.bf16.vlgmr.msra.gmra.mxu1 %vm105_vm0, %v1346_v62 }
0x114d   :  { %v1377_v60 = vpop.f32.mrf.mxu1 }
0x114e   :  { %v1378_v19 = vadd.f32 %v1642_v17, %v1377_v60 }
0x1150   :  { %v1563_v20 = vmul.f32 -1.442695, %v1378_v19 }
0x1152   :  { %1705 = vpow2.f32 %v1563_v20 }
0x1155   :  { %v1379_v21 = vpop.f32.mrf.mxu1 }
0x1158   :  { %v1706_v22 = vpop.eup %1705 }
0x1159   :  { %v1384_v23 = vadd.f32 1.0, %v1706_v22 }
0x115b   :  { %1707 = vrcp.f32 %v1384_v23  ;;  %v1396_v27 = vand.u32 2147483648, %v1384_v23  ;;  %v1394_v30 = vand.u32 2147483647, %v1384_v23  ;;  %vm1390_vm0 = vweird.f32 %v1384_v23 }
0x115d   :  { %v1397_v33 = vor.u32 1.1754944e-38, %v1396_v27  ;;  %vm1395_vm9 = vcmp.eq.f32.partialorder %v1394_v30, 8.507059e+37 }
0x1161   :  { %v1708_v24 = vpop.eup %1707 }
0x1162   :  { %v1386_v25 = vmul.f32 %v1708_v24, %v1384_v23  ;;  %vm1391_vm7 = vweird.f32 %v1708_v24 }
0x1163   :  { %vm1392_vm8 = vmor %vm1390_vm0, %vm1391_vm7 }
0x1164   :  { %v1387_v26 = vsub.f32 1.0, %v1386_v25 }
0x1166   :  { %v1388_v29 = vmul.f32 %v1708_v24, %v1387_v26 }
0x1168   :  { %v1389_v32 = vadd.f32 %v1708_v24, %v1388_v29 }
0x116a   :  { %v1393_v15 = vsel %vm1392_vm8, %v1708_v24, %v1389_v32 }
0x116b   :  { %v1398_v34 = vsel %vm1395_vm9, %v1397_v33, %v1393_v15 }
0x116c   :  { %1400 = vst [vmem:[#allocation11] sm:$0x3] %v1398_v34 }
0x116d   :  { %1411 = dma.vmem_to_hbm [thread:$0]  %s1407_s22, 32, %s1409_s25, [#allocation4]  }
0x116e   :  { %1859 = dma.done.wait [#allocation4], 32  }
0x116f   :  { %1860 = vsyncadd [#allocation4], 4294967264 }
0x1170   :  { %1416 = vsyncpa [#allocation3], 1 }
0x1171   :  { %1417 = vsyncpa [#allocation6], 1 }
0x1172   :  { %1418 = vsyncpa [#allocation9], 1 }
0x1173   :  { %1419 = vsyncpa [#allocation4], 1 }

</bundles_post_ra>
